<compile_context>
chip_gen: v6e
topology: v6e:2x2x1
jax: 0.10.0
libtpu: 0.0.40
codegen_flags: <defaults>
</compile_context>

<pallas_src>
import math

import jax
import jax.numpy as jnp
from jax.experimental import pallas as pl
from jax.experimental.pallas import tpu as pltpu

# ---------------- semantic hyperparameters (small, consistent w/ module) ----
EMB_DIM = 32
HIDDEN_DIM = 64
N_LAYERS = 2
INPUT_VOCAB = 20      # len(text_vocab)
OUTPUT_VOCAB = 24     # len(headline_vocab)  (decoder.output_dim)
SRC_LEN = 10
TGT_LEN = 8
BATCH = 2
TEACHER_FORCING_RATIO = 0.75

# ---------------- padded, lane-aligned internal sizes -----------------------
EP = 128      # padded embedding dim          (lane-aligned matmul K blocks)
HP = 128      # padded hidden dim             (each gate = one full 128-lane vreg)
VP = 128      # padded output vocab           (lane-dense FC output / one-hot)
B_PAD = 8     # padded batch                  (full sublanes)


# ---------------------------- in-kernel LSTM cell ----------------------------
def _lstm_cell(x, h, c, w_ref, b_ref):
    """x:(B,128)  h,c:(B,HP)  w:(256,4*HP)  b:(1,4*HP) -> (h_new, c_new)."""
    xh = jnp.concatenate([x, h], axis=-1)                       # (B, 256)
    gates = jnp.dot(xh, w_ref[...],
                    preferred_element_type=jnp.float32) + b_ref[...]
    sig = jax.nn.sigmoid(gates)                                 # whole tile -> EUP
    i = sig[:, 0 * HP:1 * HP]                                   # gate order i,f,g,o
    f = sig[:, 1 * HP:2 * HP]
    o = sig[:, 3 * HP:4 * HP]
    g = jnp.tanh(gates[:, 2 * HP:3 * HP])
    c_new = f * c + i * g
    h_new = o * jnp.tanh(c_new)
    return h_new, c_new


# ------------------------------ encoder kernel -------------------------------
def _encoder_kernel(x_ref, w0_ref, b0_ref, w1_ref, b1_ref, h_ref, c_ref):
    @pl.when(pl.program_id(0) == 0)
    def _():
        h_ref[...] = jnp.zeros_like(h_ref)
        c_ref[...] = jnp.zeros_like(c_ref)

    x = x_ref[0]                                                # (B_PAD, EP)
    h0, c0 = _lstm_cell(x, h_ref[0], c_ref[0], w0_ref, b0_ref)
    h1, c1 = _lstm_cell(h0, h_ref[1], c_ref[1], w1_ref, b1_ref)
    h_ref[0] = h0
    c_ref[0] = c0
    h_ref[1] = h1
    c_ref[1] = c1


def encoder_forward(params, emb_x):
    """emb_x: (SRC_LEN, B_PAD, EP) -> (h, c), each (N_LAYERS, B_PAD, HP)."""
    grid_spec = pltpu.PrefetchScalarGridSpec(
        num_scalar_prefetch=0,
        grid=(SRC_LEN,),
        in_specs=[
            pl.BlockSpec((1, B_PAD, EP), lambda t: (t, 0, 0)),        # x_t
            pl.BlockSpec((EP + HP, 4 * HP), lambda t: (0, 0)),        # W layer 0
            pl.BlockSpec((1, 4 * HP), lambda t: (0, 0)),              # b layer 0
            pl.BlockSpec((2 * HP, 4 * HP), lambda t: (0, 0)),         # W layer 1
            pl.BlockSpec((1, 4 * HP), lambda t: (0, 0)),              # b layer 1
        ],
        out_specs=[
            pl.BlockSpec((N_LAYERS, B_PAD, HP), lambda t: (0, 0, 0)),  # h state
            pl.BlockSpec((N_LAYERS, B_PAD, HP), lambda t: (0, 0, 0)),  # c state
        ],
    )
    h, c = pl.pallas_call(
        _encoder_kernel,
        out_shape=(jax.ShapeDtypeStruct((N_LAYERS, B_PAD, HP), jnp.float32),
                   jax.ShapeDtypeStruct((N_LAYERS, B_PAD, HP), jnp.float32)),
        grid_spec=grid_spec,
        compiler_params=pltpu.CompilerParams(
            dimension_semantics=("arbitrary",)),
    )(emb_x, params["enc_w0"], params["enc_b0"],
      params["enc_w1"], params["enc_b1"])
    return h, c


# ------------------------------ decoder kernel -------------------------------
def _decoder_kernel(tf_ref, y0_ref, yt_ref, h_init_ref, c_init_ref, emb_ref,
                    w0_ref, b0_ref, w1_ref, b1_ref, fcw_ref, fcb_ref,
                    out_ref, h_s, c_s, in_s):
    s = pl.program_id(0)
    t = s + 1                                  # decode index t = 1..TGT_LEN-1

    @pl.when(s == 0)
    def _():
        h_s[...] = h_init_ref[...]
        c_s[...] = c_init_ref[...]
        in_s[...] = y0_ref[0]                  # one-hot of y[0, :]

    onehot = in_s[...]                                            # (B_PAD, VP)
    x = jnp.dot(onehot, emb_ref[...],
                preferred_element_type=jnp.float32)               # (B_PAD, EP)

    h0, c0 = _lstm_cell(x, h_s[0], c_s[0], w0_ref, b0_ref)
    h1, c1 = _lstm_cell(h0, h_s[1], c_s[1], w1_ref, b1_ref)
    h_s[0] = h0
    c_s[0] = c0
    h_s[1] = h1
    c_s[1] = c1

    logits = jnp.dot(h1, fcw_ref[...],
                     preferred_element_type=jnp.float32) + fcb_ref[...]
    out_ref[0] = logits                                           # lane-dense

    # greedy argmax over the real vocab lanes (first-max tie break),
    # re-encoded as a one-hot row for next step's embedding matmul.
    lane = jax.lax.broadcasted_iota(jnp.int32, (B_PAD, VP), 1)
    lane_f = lane.astype(jnp.float32)
    masked = jnp.where(lane < OUTPUT_VOCAB, logits, -1e30)
    m = jnp.max(masked, axis=1, keepdims=True)
    idx = jnp.min(jnp.where(masked == m, lane_f, float(VP)),
                  axis=1, keepdims=True)                          # (B_PAD, 1)
    pred_onehot = (lane_f == idx).astype(jnp.float32)             # (B_PAD, VP)

    # teacher forcing: scalar flag in SMEM selects y[t] vs greedy prediction.
    sel = (tf_ref[t] > 0).astype(jnp.float32)
    in_s[...] = sel * yt_ref[0] + (1.0 - sel) * pred_onehot


def decoder_forward(params, tf_flags_i32, y_onehot, h_enc, c_enc):
    """Decode steps t = 1..TGT_LEN-1 in one call -> (TGT_LEN-1, B_PAD, VP)."""
    grid_spec = pltpu.PrefetchScalarGridSpec(
        num_scalar_prefetch=1,                      # teacher-forcing flags
        grid=(TGT_LEN - 1,),
        in_specs=[
            pl.BlockSpec((1, B_PAD, VP), lambda s, tf: (0, 0, 0)),      # y[0]
            pl.BlockSpec((1, B_PAD, VP), lambda s, tf: (s + 1, 0, 0)),  # y[t]
            pl.BlockSpec((N_LAYERS, B_PAD, HP), lambda s, tf: (0, 0, 0)),  # h0
            pl.BlockSpec((N_LAYERS, B_PAD, HP), lambda s, tf: (0, 0, 0)),  # c0
            pl.BlockSpec((VP, EP), lambda s, tf: (0, 0)),               # dec emb
            pl.BlockSpec((EP + HP, 4 * HP), lambda s, tf: (0, 0)),      # W l0
            pl.BlockSpec((1, 4 * HP), lambda s, tf: (0, 0)),            # b l0
            pl.BlockSpec((2 * HP, 4 * HP), lambda s, tf: (0, 0)),       # W l1
            pl.BlockSpec((1, 4 * HP), lambda s, tf: (0, 0)),            # b l1
            pl.BlockSpec((HP, VP), lambda s, tf: (0, 0)),               # fc W
            pl.BlockSpec((1, VP), lambda s, tf: (0, 0)),                # fc b
        ],
        out_specs=pl.BlockSpec((1, B_PAD, VP), lambda s, tf: (s, 0, 0)),
        scratch_shapes=[
            pltpu.VMEM((N_LAYERS, B_PAD, HP), jnp.float32),   # h state
            pltpu.VMEM((N_LAYERS, B_PAD, HP), jnp.float32),   # c state
            pltpu.VMEM((B_PAD, VP), jnp.float32),             # next-input one-hot
        ],
    )
    return pl.pallas_call(
        _decoder_kernel,
        out_shape=jax.ShapeDtypeStruct((TGT_LEN - 1, B_PAD, VP), jnp.float32),
        grid_spec=grid_spec,
        compiler_params=pltpu.CompilerParams(
            dimension_semantics=("arbitrary",)),
    )(tf_flags_i32, y_onehot, y_onehot, h_enc, c_enc,
      params["dec_emb"], params["dec_w0"], params["dec_b0"],
      params["dec_w1"], params["dec_b1"], params["fc_w"], params["fc_b"])


# ------------------------- parameter construction ---------------------------
def _uniform(key, shape, k):
    return jax.random.uniform(key, shape, jnp.float32, minval=-k, maxval=k)


def _raw_lstm_params(key, input_size, hidden, n_layers):
    """PyTorch-layout params per layer: (w_ih (4H,in), w_hh (4H,H), b (4H,))."""
    k = 1.0 / math.sqrt(hidden)
    layers = []
    for layer in range(n_layers):
        in_sz = input_size if layer == 0 else hidden
        key, k1, k2, k3, k4 = jax.random.split(key, 5)
        w_ih = _uniform(k1, (4 * hidden, in_sz), k)
        w_hh = _uniform(k2, (4 * hidden, hidden), k)
        b = _uniform(k3, (4 * hidden,), k) + _uniform(k4, (4 * hidden,), k)
        layers.append((w_ih, w_hh, b))
    return layers


def make_raw_params(key):
    keys = jax.random.split(key, 6)
    k_fc = 1.0 / math.sqrt(HIDDEN_DIM)
    return dict(
        enc_emb=jax.random.normal(keys[0], (INPUT_VOCAB, EMB_DIM), jnp.float32),
        dec_emb=jax.random.normal(keys[1], (OUTPUT_VOCAB, EMB_DIM), jnp.float32),
        enc_lstm=_raw_lstm_params(keys[2], EMB_DIM, HIDDEN_DIM, N_LAYERS),
        dec_lstm=_raw_lstm_params(keys[3], EMB_DIM, HIDDEN_DIM, N_LAYERS),
        fc_w=_uniform(keys[4], (OUTPUT_VOCAB, HIDDEN_DIM), k_fc),
        fc_b=_uniform(keys[5], (OUTPUT_VOCAB,), k_fc),
    )


def _pad2(a, shape):
    return jnp.zeros(shape, jnp.float32).at[:a.shape[0], :a.shape[1]].set(a)


def _pad_gate_cols(wt):
    """(rows, 4H) -> (rows, 4*HP): each gate block placed in a 128-lane slot."""
    H = HIDDEN_DIM
    out = jnp.zeros((wt.shape[0], 4 * HP), jnp.float32)
    for g in range(4):
        out = out.at[:, g * HP:g * HP + H].set(wt[:, g * H:(g + 1) * H])
    return out


def _pack_lstm_layer(w_ih, w_hh, b, in_pad):
    """Fuse+pad: W (in_pad+HP, 4*HP) so gates = [x, h] @ W + b; b (1, 4*HP)."""
    wih_t = _pad_gate_cols(w_ih.T)                  # (in_sz, 4*HP)
    whh_t = _pad_gate_cols(w_hh.T)                  # (H,     4*HP)
    w = jnp.zeros((in_pad + HP, 4 * HP), jnp.float32)
    w = w.at[:wih_t.shape[0]].set(wih_t)
    w = w.at[in_pad:in_pad + HIDDEN_DIM].set(whh_t)
    b_pad = _pad_gate_cols(b.reshape(1, 4 * HIDDEN_DIM))
    return w, b_pad


def make_kernel_params(raw):
    p = {}
    p["enc_emb"] = _pad2(raw["enc_emb"], (INPUT_VOCAB, EP))
    p["dec_emb"] = _pad2(raw["dec_emb"], (VP, EP))
    for name, layers in (("enc", raw["enc_lstm"]), ("dec", raw["dec_lstm"])):
        for layer, (w_ih, w_hh, b) in enumerate(layers):
            in_pad = EP if layer == 0 else HP
            w, bp = _pack_lstm_layer(w_ih, w_hh, b, in_pad)
            p[f"{name}_w{layer}"] = w
            p[f"{name}_b{layer}"] = bp
    p["fc_w"] = _pad2(raw["fc_w"].T, (HP, VP))
    p["fc_b"] = _pad2(raw["fc_b"].reshape(1, -1), (1, VP))
    return p


# ------------------------------ forward pass ---------------------------------
@jax.jit
def encoder_decoder_forward(params, x_tokens, y_tokens, teacher_force_flags):
    """x:(SRC_LEN,B) int32  y:(TGT_LEN,B) int32  flags:(TGT_LEN,) bool.
    Returns (TGT_LEN, BATCH, OUTPUT_VOCAB); row 0 is zeros (as in the module)."""
    xp = jnp.zeros((SRC_LEN, B_PAD), jnp.int32).at[:, :BATCH].set(x_tokens)
    yp = jnp.zeros((TGT_LEN, B_PAD), jnp.int32).at[:, :BATCH].set(y_tokens)

    emb_x = jnp.take(params["enc_emb"], xp, axis=0)          # (SRC_LEN,B_PAD,EP)
    h_enc, c_enc = encoder_forward(params, emb_x)

    lane = jnp.arange(VP, dtype=jnp.int32)
    y_onehot = (yp[..., None] == lane).astype(jnp.float32)   # (TGT_LEN,B_PAD,VP)
    tf_i32 = teacher_force_flags.astype(jnp.int32)

    logits = decoder_forward(params, tf_i32, y_onehot, h_enc, c_enc)

    outputs = jnp.zeros((TGT_LEN, BATCH, OUTPUT_VOCAB), jnp.float32)
    return outputs.at[1:].set(logits[:, :BATCH, :OUTPUT_VOCAB])


# -------------------------- pure-JAX reference -------------------------------
def _ref_cell(x, h, c, layer_params):
    w_ih, w_hh, b = layer_params
    gates = x @ w_ih.T + h @ w_hh.T + b
    H = HIDDEN_DIM
    i = jax.nn.sigmoid(gates[:, 0 * H:1 * H])
    f = jax.nn.sigmoid(gates[:, 1 * H:2 * H])
    g = jnp.tanh(gates[:, 2 * H:3 * H])
    o = jax.nn.sigmoid(gates[:, 3 * H:4 * H])
    c_new = f * c + i * g
    return o * jnp.tanh(c_new), c_new


def reference_forward(raw, x_tokens, y_tokens, teacher_force_flags):
    h = [jnp.zeros((BATCH, HIDDEN_DIM), jnp.float32) for _ in range(N_LAYERS)]
    c = [jnp.zeros((BATCH, HIDDEN_DIM), jnp.float32) for _ in range(N_LAYERS)]
    emb = raw["enc_emb"][x_tokens]
    for t in range(SRC_LEN):
        inp = emb[t]
        for l in range(N_LAYERS):
            h[l], c[l] = _ref_cell(inp, h[l], c[l], raw["enc_lstm"][l])
            inp = h[l]
    outputs = jnp.zeros((TGT_LEN, BATCH, OUTPUT_VOCAB), jnp.float32)
    tok = y_tokens[0]
    for t in range(1, TGT_LEN):
        inp = raw["dec_emb"][tok]
        for l in range(N_LAYERS):
            h[l], c[l] = _ref_cell(inp, h[l], c[l], raw["dec_lstm"][l])
            inp = h[l]
        preds = h[-1] @ raw["fc_w"].T + raw["fc_b"]
        outputs = outputs.at[t].set(preds)
        pred_tok = jnp.argmax(preds, axis=1).astype(y_tokens.dtype)
        tok = jnp.where(teacher_force_flags[t], y_tokens[t], pred_tok)
    return outputs


# ----------------------------------- main ------------------------------------
if __name__ == "__main__":
    root = jax.random.PRNGKey(0)
    k_params, k_x, k_y, k_tf = jax.random.split(root, 4)

    raw = make_raw_params(k_params)
    params = make_kernel_params(raw)

    x = jax.random.randint(k_x, (SRC_LEN, BATCH), 0, INPUT_VOCAB, jnp.int32)
    y = jax.random.randint(k_y, (TGT_LEN, BATCH), 0, OUTPUT_VOCAB, jnp.int32)
    # deterministic replacement for random.random() < teacher_forcing_ratio
    tf_flags = jax.random.uniform(k_tf, (TGT_LEN,)) < TEACHER_FORCING_RATIO

    out = encoder_decoder_forward(params, x, y, tf_flags)
    jax.block_until_ready(out)
    assert out.shape == (TGT_LEN, BATCH, OUTPUT_VOCAB)

    ref = reference_forward(raw, x, y, tf_flags)
    max_err = float(jnp.max(jnp.abs(out - ref)))
    assert max_err < 1e-2, f"kernel/reference mismatch: {max_err}"

    print("KERNEL_OK")
</pallas_src>

<mosaic_0001>
module attributes {stable_mosaic.version = 11 : i64} {
  func.func @_encoder_kernel(%arg0: i32, %arg1: memref<1x8x128xf32, #tpu.memory_space<vmem>>, %arg2: memref<256x512xf32, #tpu.memory_space<vmem>>, %arg3: memref<1x512xf32, #tpu.memory_space<vmem>>, %arg4: memref<256x512xf32, #tpu.memory_space<vmem>>, %arg5: memref<1x512xf32, #tpu.memory_space<vmem>>, %arg6: memref<2x8x128xf32, #tpu.memory_space<vmem>>, %arg7: memref<2x8x128xf32, #tpu.memory_space<vmem>>) attributes {dimension_semantics = [#tpu.dimension_semantics<arbitrary>], iteration_bounds = array<i64: 10>, scalar_prefetch = 0 : i64, scratch_operands = 0 : i64, tpu.core_type = #tpu.core_type<tc>, window_params = [{transform_indices = @transform_0, window_bounds = array<i64: 1, 8, 128>}, {pipeline_mode = #tpu.pipeline_mode<synchronous>, transform_indices = @transform_1, window_bounds = array<i64: 256, 512>}, {pipeline_mode = #tpu.pipeline_mode<synchronous>, transform_indices = @transform_2, window_bounds = array<i64: 1, 512>}, {pipeline_mode = #tpu.pipeline_mode<synchronous>, transform_indices = @transform_3, window_bounds = array<i64: 256, 512>}, {pipeline_mode = #tpu.pipeline_mode<synchronous>, transform_indices = @transform_4, window_bounds = array<i64: 1, 512>}, {pipeline_mode = #tpu.pipeline_mode<synchronous>, transform_indices = @transform_5, window_bounds = array<i64: 2, 8, 128>}, {pipeline_mode = #tpu.pipeline_mode<synchronous>, transform_indices = @transform_6, window_bounds = array<i64: 2, 8, 128>}]} {
    %c0_i32 = arith.constant 0 : i32
    %0 = arith.cmpi eq, %arg0, %c0_i32 : i32
    %1 = arith.extui %0 : i1 to i32
    %c0_i32_0 = arith.constant 0 : i32
    %2 = arith.cmpi ne, %1, %c0_i32_0 : i32
    scf.if %2 {
      %cst_37 = arith.constant 0.000000e+00 : f32
      %67 = vector.broadcast %cst_37 : f32 to vector<2x8x128xf32>
      %c0_38 = arith.constant 0 : index
      %c0_39 = arith.constant 0 : index
      %c0_40 = arith.constant 0 : index
      %68 = vector.load %arg6[%c0_38, %c0_39, %c0_40] : memref<2x8x128xf32, #tpu.memory_space<vmem>>, vector<2x8x128xf32>
      tpu.vector_store %arg6[%c0_38, %c0_39, %c0_40], %67 {strides = array<i32>} : memref<2x8x128xf32, #tpu.memory_space<vmem>>, vector<2x8x128xf32>,
      %cst_41 = arith.constant 0.000000e+00 : f32
      %69 = vector.broadcast %cst_41 : f32 to vector<2x8x128xf32>
      %c0_42 = arith.constant 0 : index
      %c0_43 = arith.constant 0 : index
      %c0_44 = arith.constant 0 : index
      %70 = vector.load %arg7[%c0_42, %c0_43, %c0_44] : memref<2x8x128xf32, #tpu.memory_space<vmem>>, vector<2x8x128xf32>
      tpu.vector_store %arg7[%c0_42, %c0_43, %c0_44], %69 {strides = array<i32>} : memref<2x8x128xf32, #tpu.memory_space<vmem>>, vector<2x8x128xf32>,
    } else {
    }
    %c0 = arith.constant 0 : index
    %c0_1 = arith.constant 0 : index
    %c0_2 = arith.constant 0 : index
    %3 = vector.load %arg1[%c0, %c0_1, %c0_2] : memref<1x8x128xf32, #tpu.memory_space<vmem>>, vector<1x8x128xf32>
    %4 = vector.shape_cast %3 : vector<1x8x128xf32> to vector<8x128xf32>
    %c0_3 = arith.constant 0 : index
    %c0_4 = arith.constant 0 : index
    %c0_5 = arith.constant 0 : index
    %5 = vector.load %arg6[%c0_3, %c0_4, %c0_5] : memref<2x8x128xf32, #tpu.memory_space<vmem>>, vector<1x8x128xf32>
    %6 = vector.shape_cast %5 : vector<1x8x128xf32> to vector<8x128xf32>
    %c0_6 = arith.constant 0 : index
    %c0_7 = arith.constant 0 : index
    %c0_8 = arith.constant 0 : index
    %7 = vector.load %arg7[%c0_6, %c0_7, %c0_8] : memref<2x8x128xf32, #tpu.memory_space<vmem>>, vector<1x8x128xf32>
    %8 = vector.shape_cast %7 : vector<1x8x128xf32> to vector<8x128xf32>
    %9 = tpu.concatenate %4, %6 in 1 : vector<8x128xf32>, vector<8x128xf32> -> vector<8x256xf32>
    %c0_9 = arith.constant 0 : index
    %c0_10 = arith.constant 0 : index
    %10 = vector.load %arg2[%c0_9, %c0_10] : memref<256x512xf32, #tpu.memory_space<vmem>>, vector<256x512xf32>
    %cst = arith.constant dense<0.000000e+00> : vector<8x512xf32>
    %11 = tpu.matmul %9, %10, %cst {dimension_numbers = #tpu.dot_dimension_numbers<[1], [0], [0], [1], [0, 0, 1, 1], [], []>} : vector<8x256xf32>, vector<256x512xf32>, vector<8x512xf32> -> vector<8x512xf32>
    %c0_11 = arith.constant 0 : index
    %c0_12 = arith.constant 0 : index
    %12 = vector.load %arg3[%c0_11, %c0_12] : memref<1x512xf32, #tpu.memory_space<vmem>>, vector<1x512xf32>
    %13 = vector.broadcast %12 : vector<1x512xf32> to vector<8x512xf32>
    %14 = arith.addf %11, %13 : vector<8x512xf32>
    %15 = arith.negf %14 : vector<8x512xf32>
    %16 = math.exp %15 : vector<8x512xf32>
    %cst_13 = arith.constant 1.000000e+00 : f32
    %17 = vector.broadcast %cst_13 : f32 to vector<8x512xf32>
    %18 = arith.addf %17, %16 : vector<8x512xf32>
    %19 = arith.divf %17, %18 : vector<8x512xf32>
    %20 = vector.extract_strided_slice %19 {offsets = [0, 0], sizes = [8, 128], strides = [1, 1]} : vector<8x512xf32> to vector<8x128xf32>
    %21 = vector.extract_strided_slice %19 {offsets = [0, 128], sizes = [8, 128], strides = [1, 1]} : vector<8x512xf32> to vector<8x128xf32>
    %22 = vector.extract_strided_slice %19 {offsets = [0, 384], sizes = [8, 128], strides = [1, 1]} : vector<8x512xf32> to vector<8x128xf32>
    %23 = vector.extract_strided_slice %14 {offsets = [0, 256], sizes = [8, 128], strides = [1, 1]} : vector<8x512xf32> to vector<8x128xf32>
    %24 = math.tanh %23 : vector<8x128xf32>
    %25 = arith.mulf %21, %8 : vector<8x128xf32>
    %26 = arith.mulf %20, %24 : vector<8x128xf32>
    %27 = arith.addf %25, %26 : vector<8x128xf32>
    %28 = math.tanh %27 : vector<8x128xf32>
    %29 = arith.mulf %22, %28 : vector<8x128xf32>
    %c1 = arith.constant 1 : index
    %c0_14 = arith.constant 0 : index
    %c0_15 = arith.constant 0 : index
    %30 = vector.load %arg6[%c1, %c0_14, %c0_15] : memref<2x8x128xf32, #tpu.memory_space<vmem>>, vector<1x8x128xf32>
    %31 = vector.shape_cast %30 : vector<1x8x128xf32> to vector<8x128xf32>
    %c1_16 = arith.constant 1 : index
    %c0_17 = arith.constant 0 : index
    %c0_18 = arith.constant 0 : index
    %32 = vector.load %arg7[%c1_16, %c0_17, %c0_18] : memref<2x8x128xf32, #tpu.memory_space<vmem>>, vector<1x8x128xf32>
    %33 = vector.shape_cast %32 : vector<1x8x128xf32> to vector<8x128xf32>
    %34 = tpu.concatenate %29, %31 in 1 : vector<8x128xf32>, vector<8x128xf32> -> vector<8x256xf32>
    %c0_19 = arith.constant 0 : index
    %c0_20 = arith.constant 0 : index
    %35 = vector.load %arg4[%c0_19, %c0_20] : memref<256x512xf32, #tpu.memory_space<vmem>>, vector<256x512xf32>
    %cst_21 = arith.constant dense<0.000000e+00> : vector<8x512xf32>
    %36 = tpu.matmul %34, %35, %cst_21 {dimension_numbers = #tpu.dot_dimension_numbers<[1], [0], [0], [1], [0, 0, 1, 1], [], []>} : vector<8x256xf32>, vector<256x512xf32>, vector<8x512xf32> -> vector<8x512xf32>
    %c0_22 = arith.constant 0 : index
    %c0_23 = arith.constant 0 : index
    %37 = vector.load %arg5[%c0_22, %c0_23] : memref<1x512xf32, #tpu.memory_space<vmem>>, vector<1x512xf32>
    %38 = vector.broadcast %37 : vector<1x512xf32> to vector<8x512xf32>
    %39 = arith.addf %36, %38 : vector<8x512xf32>
    %40 = arith.negf %39 : vector<8x512xf32>
    %41 = math.exp %40 : vector<8x512xf32>
    %cst_24 = arith.constant 1.000000e+00 : f32
    %42 = vector.broadcast %cst_24 : f32 to vector<8x512xf32>
    %43 = arith.addf %42, %41 : vector<8x512xf32>
    %44 = arith.divf %42, %43 : vector<8x512xf32>
    %45 = vector.extract_strided_slice %44 {offsets = [0, 0], sizes = [8, 128], strides = [1, 1]} : vector<8x512xf32> to vector<8x128xf32>
    %46 = vector.extract_strided_slice %44 {offsets = [0, 128], sizes = [8, 128], strides = [1, 1]} : vector<8x512xf32> to vector<8x128xf32>
    %47 = vector.extract_strided_slice %44 {offsets = [0, 384], sizes = [8, 128], strides = [1, 1]} : vector<8x512xf32> to vector<8x128xf32>
    %48 = vector.extract_strided_slice %39 {offsets = [0, 256], sizes = [8, 128], strides = [1, 1]} : vector<8x512xf32> to vector<8x128xf32>
    %49 = math.tanh %48 : vector<8x128xf32>
    %50 = arith.mulf %46, %33 : vector<8x128xf32>
    %51 = arith.mulf %45, %49 : vector<8x128xf32>
    %52 = arith.addf %50, %51 : vector<8x128xf32>
    %53 = math.tanh %52 : vector<8x128xf32>
    %54 = arith.mulf %47, %53 : vector<8x128xf32>
    %c0_25 = arith.constant 0 : index
    %c0_26 = arith.constant 0 : index
    %c0_27 = arith.constant 0 : index
    %55 = vector.load %arg6[%c0_25, %c0_26, %c0_27] : memref<2x8x128xf32, #tpu.memory_space<vmem>>, vector<1x8x128xf32>
    %56 = vector.shape_cast %55 : vector<1x8x128xf32> to vector<8x128xf32>
    %57 = vector.shape_cast %29 : vector<8x128xf32> to vector<1x8x128xf32>
    tpu.vector_store %arg6[%c0_25, %c0_26, %c0_27], %57 {strides = array<i32>} : memref<2x8x128xf32, #tpu.memory_space<vmem>>, vector<1x8x128xf32>,
    %c0_28 = arith.constant 0 : index
    %c0_29 = arith.constant 0 : index
    %c0_30 = arith.constant 0 : index
    %58 = vector.load %arg7[%c0_28, %c0_29, %c0_30] : memref<2x8x128xf32, #tpu.memory_space<vmem>>, vector<1x8x128xf32>
    %59 = vector.shape_cast %58 : vector<1x8x128xf32> to vector<8x128xf32>
    %60 = vector.shape_cast %27 : vector<8x128xf32> to vector<1x8x128xf32>
    tpu.vector_store %arg7[%c0_28, %c0_29, %c0_30], %60 {strides = array<i32>} : memref<2x8x128xf32, #tpu.memory_space<vmem>>, vector<1x8x128xf32>,
    %c1_31 = arith.constant 1 : index
    %c0_32 = arith.constant 0 : index
    %c0_33 = arith.constant 0 : index
    %61 = vector.load %arg6[%c1_31, %c0_32, %c0_33] : memref<2x8x128xf32, #tpu.memory_space<vmem>>, vector<1x8x128xf32>
    %62 = vector.shape_cast %61 : vector<1x8x128xf32> to vector<8x128xf32>
    %63 = vector.shape_cast %54 : vector<8x128xf32> to vector<1x8x128xf32>
    tpu.vector_store %arg6[%c1_31, %c0_32, %c0_33], %63 {strides = array<i32>} : memref<2x8x128xf32, #tpu.memory_space<vmem>>, vector<1x8x128xf32>,
    %c1_34 = arith.constant 1 : index
    %c0_35 = arith.constant 0 : index
    %c0_36 = arith.constant 0 : index
    %64 = vector.load %arg7[%c1_34, %c0_35, %c0_36] : memref<2x8x128xf32, #tpu.memory_space<vmem>>, vector<1x8x128xf32>
    %65 = vector.shape_cast %64 : vector<1x8x128xf32> to vector<8x128xf32>
    %66 = vector.shape_cast %52 : vector<8x128xf32> to vector<1x8x128xf32>
    tpu.vector_store %arg7[%c1_34, %c0_35, %c0_36], %66 {strides = array<i32>} : memref<2x8x128xf32, #tpu.memory_space<vmem>>, vector<1x8x128xf32>,
    return
  }
  func.func @transform_0(%arg0: i32) -> (i32, i32, i32) {
    %c0_i32 = arith.constant 0 : i32
    %c0_i32_0 = arith.constant 0 : i32
    %c0_i32_1 = arith.constant 0 : i32
    return %arg0, %c0_i32, %c0_i32_0 : i32, i32, i32
  }
  func.func @transform_1(%arg0: i32) -> (i32, i32) {
    %c0_i32 = arith.constant 0 : i32
    %c0_i32_0 = arith.constant 0 : i32
    %c0_i32_1 = arith.constant 0 : i32
    return %c0_i32, %c0_i32_0 : i32, i32
  }
  func.func @transform_2(%arg0: i32) -> (i32, i32) {
    %c0_i32 = arith.constant 0 : i32
    %c0_i32_0 = arith.constant 0 : i32
    %c0_i32_1 = arith.constant 0 : i32
    return %c0_i32, %c0_i32_0 : i32, i32
  }
  func.func @transform_3(%arg0: i32) -> (i32, i32) {
    %c0_i32 = arith.constant 0 : i32
    %c0_i32_0 = arith.constant 0 : i32
    %c0_i32_1 = arith.constant 0 : i32
    return %c0_i32, %c0_i32_0 : i32, i32
  }
  func.func @transform_4(%arg0: i32) -> (i32, i32) {
    %c0_i32 = arith.constant 0 : i32
    %c0_i32_0 = arith.constant 0 : i32
    %c0_i32_1 = arith.constant 0 : i32
    return %c0_i32, %c0_i32_0 : i32, i32
  }
  func.func @transform_5(%arg0: i32) -> (i32, i32, i32) {
    %c0_i32 = arith.constant 0 : i32
    %c0_i32_0 = arith.constant 0 : i32
    %c0_i32_1 = arith.constant 0 : i32
    %c0_i32_2 = arith.constant 0 : i32
    return %c0_i32, %c0_i32_0, %c0_i32_1 : i32, i32, i32
  }
  func.func @transform_6(%arg0: i32) -> (i32, i32, i32) {
    %c0_i32 = arith.constant 0 : i32
    %c0_i32_0 = arith.constant 0 : i32
    %c0_i32_1 = arith.constant 0 : i32
    %c0_i32_2 = arith.constant 0 : i32
    return %c0_i32, %c0_i32_0, %c0_i32_1 : i32, i32, i32
  }
}

module attributes {stable_mosaic.version = 11 : i64} {
  func.func @_decoder_kernel(%arg0: i32, %arg1: memref<8xi32, #tpu.memory_space<smem>>, %arg2: memref<1x8x128xf32, #tpu.memory_space<vmem>>, %arg3: memref<1x8x128xf32, #tpu.memory_space<vmem>>, %arg4: memref<2x8x128xf32, #tpu.memory_space<vmem>>, %arg5: memref<2x8x128xf32, #tpu.memory_space<vmem>>, %arg6: memref<128x128xf32, #tpu.memory_space<vmem>>, %arg7: memref<256x512xf32, #tpu.memory_space<vmem>>, %arg8: memref<1x512xf32, #tpu.memory_space<vmem>>, %arg9: memref<256x512xf32, #tpu.memory_space<vmem>>, %arg10: memref<1x512xf32, #tpu.memory_space<vmem>>, %arg11: memref<128x128xf32, #tpu.memory_space<vmem>>, %arg12: memref<1x128xf32, #tpu.memory_space<vmem>>, %arg13: memref<1x8x128xf32, #tpu.memory_space<vmem>>, %arg14: memref<2x8x128xf32, #tpu.memory_space<vmem>>, %arg15: memref<2x8x128xf32, #tpu.memory_space<vmem>>, %arg16: memref<8x128xf32, #tpu.memory_space<vmem>>) attributes {dimension_semantics = [#tpu.dimension_semantics<arbitrary>], iteration_bounds = array<i64: 7>, scalar_prefetch = 1 : i64, scratch_operands = 3 : i64, tpu.core_type = #tpu.core_type<tc>, window_params = [{transform_indices = @transform_0, window_bounds = array<i64: 1, 8, 128>}, {transform_indices = @transform_1, window_bounds = array<i64: 1, 8, 128>}, {pipeline_mode = #tpu.pipeline_mode<synchronous>, transform_indices = @transform_2, window_bounds = array<i64: 2, 8, 128>}, {pipeline_mode = #tpu.pipeline_mode<synchronous>, transform_indices = @transform_3, window_bounds = array<i64: 2, 8, 128>}, {pipeline_mode = #tpu.pipeline_mode<synchronous>, transform_indices = @transform_4, window_bounds = array<i64: 128, 128>}, {pipeline_mode = #tpu.pipeline_mode<synchronous>, transform_indices = @transform_5, window_bounds = array<i64: 256, 512>}, {pipeline_mode = #tpu.pipeline_mode<synchronous>, transform_indices = @transform_6, window_bounds = array<i64: 1, 512>}, {pipeline_mode = #tpu.pipeline_mode<synchronous>, transform_indices = @transform_7, window_bounds = array<i64: 256, 512>}, {pipeline_mode = #tpu.pipeline_mode<synchronous>, transform_indices = @transform_8, window_bounds = array<i64: 1, 512>}, {pipeline_mode = #tpu.pipeline_mode<synchronous>, transform_indices = @transform_9, window_bounds = array<i64: 128, 128>}, {pipeline_mode = #tpu.pipeline_mode<synchronous>, transform_indices = @transform_10, window_bounds = array<i64: 1, 128>}, {transform_indices = @transform_11, window_bounds = array<i64: 1, 8, 128>}]} {
    %c1_i32 = arith.constant 1 : i32
    %0 = arith.addi %arg0, %c1_i32 : i32
    %c0_i32 = arith.constant 0 : i32
    %1 = arith.cmpi eq, %arg0, %c0_i32 : i32
    %2 = arith.extui %1 : i1 to i32
    %c0_i32_0 = arith.constant 0 : i32
    %3 = arith.cmpi ne, %2, %c0_i32_0 : i32
    scf.if %3 {
      %c0_58 = arith.constant 0 : index
      %c0_59 = arith.constant 0 : index
      %c0_60 = arith.constant 0 : index
      %109 = vector.load %arg4[%c0_58, %c0_59, %c0_60] : memref<2x8x128xf32, #tpu.memory_space<vmem>>, vector<2x8x128xf32>
      %c0_61 = arith.constant 0 : index
      %c0_62 = arith.constant 0 : index
      %c0_63 = arith.constant 0 : index
      %110 = vector.load %arg14[%c0_61, %c0_62, %c0_63] : memref<2x8x128xf32, #tpu.memory_space<vmem>>, vector<2x8x128xf32>
      tpu.vector_store %arg14[%c0_61, %c0_62, %c0_63], %109 {strides = array<i32>} : memref<2x8x128xf32, #tpu.memory_space<vmem>>, vector<2x8x128xf32>,
      %c0_64 = arith.constant 0 : index
      %c0_65 = arith.constant 0 : index
      %c0_66 = arith.constant 0 : index
      %111 = vector.load %arg5[%c0_64, %c0_65, %c0_66] : memref<2x8x128xf32, #tpu.memory_space<vmem>>, vector<2x8x128xf32>
      %c0_67 = arith.constant 0 : index
      %c0_68 = arith.constant 0 : index
      %c0_69 = arith.constant 0 : index
      %112 = vector.load %arg15[%c0_67, %c0_68, %c0_69] : memref<2x8x128xf32, #tpu.memory_space<vmem>>, vector<2x8x128xf32>
      tpu.vector_store %arg15[%c0_67, %c0_68, %c0_69], %111 {strides = array<i32>} : memref<2x8x128xf32, #tpu.memory_space<vmem>>, vector<2x8x128xf32>,
      %c0_70 = arith.constant 0 : index
      %c0_71 = arith.constant 0 : index
      %c0_72 = arith.constant 0 : index
      %113 = vector.load %arg2[%c0_70, %c0_71, %c0_72] : memref<1x8x128xf32, #tpu.memory_space<vmem>>, vector<1x8x128xf32>
      %114 = vector.shape_cast %113 : vector<1x8x128xf32> to vector<8x128xf32>
      %c0_73 = arith.constant 0 : index
      %c0_74 = arith.constant 0 : index
      %115 = vector.load %arg16[%c0_73, %c0_74] : memref<8x128xf32, #tpu.memory_space<vmem>>, vector<8x128xf32>
      tpu.vector_store %arg16[%c0_73, %c0_74], %114 {strides = array<i32>} : memref<8x128xf32, #tpu.memory_space<vmem>>, vector<8x128xf32>,
    } else {
    }
    %c0 = arith.constant 0 : index
    %c0_1 = arith.constant 0 : index
    %4 = vector.load %arg16[%c0, %c0_1] : memref<8x128xf32, #tpu.memory_space<vmem>>, vector<8x128xf32>
    %c0_2 = arith.constant 0 : index
    %c0_3 = arith.constant 0 : index
    %5 = vector.load %arg6[%c0_2, %c0_3] : memref<128x128xf32, #tpu.memory_space<vmem>>, vector<128x128xf32>
    %cst = arith.constant dense<0.000000e+00> : vector<8x128xf32>
    %6 = tpu.matmul %4, %5, %cst {dimension_numbers = #tpu.dot_dimension_numbers<[1], [0], [0], [1], [0, 0, 1, 1], [], []>} : vector<8x128xf32>, vector<128x128xf32>, vector<8x128xf32> -> vector<8x128xf32>
    %c0_4 = arith.constant 0 : index
    %c0_5 = arith.constant 0 : index
    %c0_6 = arith.constant 0 : index
    %7 = vector.load %arg14[%c0_4, %c0_5, %c0_6] : memref<2x8x128xf32, #tpu.memory_space<vmem>>, vector<1x8x128xf32>
    %8 = vector.shape_cast %7 : vector<1x8x128xf32> to vector<8x128xf32>
    %c0_7 = arith.constant 0 : index
    %c0_8 = arith.constant 0 : index
    %c0_9 = arith.constant 0 : index
    %9 = vector.load %arg15[%c0_7, %c0_8, %c0_9] : memref<2x8x128xf32, #tpu.memory_space<vmem>>, vector<1x8x128xf32>
    %10 = vector.shape_cast %9 : vector<1x8x128xf32> to vector<8x128xf32>
    %11 = tpu.concatenate %6, %8 in 1 : vector<8x128xf32>, vector<8x128xf32> -> vector<8x256xf32>
    %c0_10 = arith.constant 0 : index
    %c0_11 = arith.constant 0 : index
    %12 = vector.load %arg7[%c0_10, %c0_11] : memref<256x512xf32, #tpu.memory_space<vmem>>, vector<256x512xf32>
    %cst_12 = arith.constant dense<0.000000e+00> : vector<8x512xf32>
    %13 = tpu.matmul %11, %12, %cst_12 {dimension_numbers = #tpu.dot_dimension_numbers<[1], [0], [0], [1], [0, 0, 1, 1], [], []>} : vector<8x256xf32>, vector<256x512xf32>, vector<8x512xf32> -> vector<8x512xf32>
    %c0_13 = arith.constant 0 : index
    %c0_14 = arith.constant 0 : index
    %14 = vector.load %arg8[%c0_13, %c0_14] : memref<1x512xf32, #tpu.memory_space<vmem>>, vector<1x512xf32>
    %15 = vector.broadcast %14 : vector<1x512xf32> to vector<8x512xf32>
    %16 = arith.addf %13, %15 : vector<8x512xf32>
    %17 = arith.negf %16 : vector<8x512xf32>
    %18 = math.exp %17 : vector<8x512xf32>
    %cst_15 = arith.constant 1.000000e+00 : f32
    %19 = vector.broadcast %cst_15 : f32 to vector<8x512xf32>
    %20 = arith.addf %19, %18 : vector<8x512xf32>
    %21 = arith.divf %19, %20 : vector<8x512xf32>
    %22 = vector.extract_strided_slice %21 {offsets = [0, 0], sizes = [8, 128], strides = [1, 1]} : vector<8x512xf32> to vector<8x128xf32>
    %23 = vector.extract_strided_slice %21 {offsets = [0, 128], sizes = [8, 128], strides = [1, 1]} : vector<8x512xf32> to vector<8x128xf32>
    %24 = vector.extract_strided_slice %21 {offsets = [0, 384], sizes = [8, 128], strides = [1, 1]} : vector<8x512xf32> to vector<8x128xf32>
    %25 = vector.extract_strided_slice %16 {offsets = [0, 256], sizes = [8, 128], strides = [1, 1]} : vector<8x512xf32> to vector<8x128xf32>
    %26 = math.tanh %25 : vector<8x128xf32>
    %27 = arith.mulf %23, %10 : vector<8x128xf32>
    %28 = arith.mulf %22, %26 : vector<8x128xf32>
    %29 = arith.addf %27, %28 : vector<8x128xf32>
    %30 = math.tanh %29 : vector<8x128xf32>
    %31 = arith.mulf %24, %30 : vector<8x128xf32>
    %c1 = arith.constant 1 : index
    %c0_16 = arith.constant 0 : index
    %c0_17 = arith.constant 0 : index
    %32 = vector.load %arg14[%c1, %c0_16, %c0_17] : memref<2x8x128xf32, #tpu.memory_space<vmem>>, vector<1x8x128xf32>
    %33 = vector.shape_cast %32 : vector<1x8x128xf32> to vector<8x128xf32>
    %c1_18 = arith.constant 1 : index
    %c0_19 = arith.constant 0 : index
    %c0_20 = arith.constant 0 : index
    %34 = vector.load %arg15[%c1_18, %c0_19, %c0_20] : memref<2x8x128xf32, #tpu.memory_space<vmem>>, vector<1x8x128xf32>
    %35 = vector.shape_cast %34 : vector<1x8x128xf32> to vector<8x128xf32>
    %36 = tpu.concatenate %31, %33 in 1 : vector<8x128xf32>, vector<8x128xf32> -> vector<8x256xf32>
    %c0_21 = arith.constant 0 : index
    %c0_22 = arith.constant 0 : index
    %37 = vector.load %arg9[%c0_21, %c0_22] : memref<256x512xf32, #tpu.memory_space<vmem>>, vector<256x512xf32>
    %cst_23 = arith.constant dense<0.000000e+00> : vector<8x512xf32>
    %38 = tpu.matmul %36, %37, %cst_23 {dimension_numbers = #tpu.dot_dimension_numbers<[1], [0], [0], [1], [0, 0, 1, 1], [], []>} : vector<8x256xf32>, vector<256x512xf32>, vector<8x512xf32> -> vector<8x512xf32>
    %c0_24 = arith.constant 0 : index
    %c0_25 = arith.constant 0 : index
    %39 = vector.load %arg10[%c0_24, %c0_25] : memref<1x512xf32, #tpu.memory_space<vmem>>, vector<1x512xf32>
    %40 = vector.broadcast %39 : vector<1x512xf32> to vector<8x512xf32>
    %41 = arith.addf %38, %40 : vector<8x512xf32>
    %42 = arith.negf %41 : vector<8x512xf32>
    %43 = math.exp %42 : vector<8x512xf32>
    %cst_26 = arith.constant 1.000000e+00 : f32
    %44 = vector.broadcast %cst_26 : f32 to vector<8x512xf32>
    %45 = arith.addf %44, %43 : vector<8x512xf32>
    %46 = arith.divf %44, %45 : vector<8x512xf32>
    %47 = vector.extract_strided_slice %46 {offsets = [0, 0], sizes = [8, 128], strides = [1, 1]} : vector<8x512xf32> to vector<8x128xf32>
    %48 = vector.extract_strided_slice %46 {offsets = [0, 128], sizes = [8, 128], strides = [1, 1]} : vector<8x512xf32> to vector<8x128xf32>
    %49 = vector.extract_strided_slice %46 {offsets = [0, 384], sizes = [8, 128], strides = [1, 1]} : vector<8x512xf32> to vector<8x128xf32>
    %50 = vector.extract_strided_slice %41 {offsets = [0, 256], sizes = [8, 128], strides = [1, 1]} : vector<8x512xf32> to vector<8x128xf32>
    %51 = math.tanh %50 : vector<8x128xf32>
    %52 = arith.mulf %48, %35 : vector<8x128xf32>
    %53 = arith.mulf %47, %51 : vector<8x128xf32>
    %54 = arith.addf %52, %53 : vector<8x128xf32>
    %55 = math.tanh %54 : vector<8x128xf32>
    %56 = arith.mulf %49, %55 : vector<8x128xf32>
    %c0_27 = arith.constant 0 : index
    %c0_28 = arith.constant 0 : index
    %c0_29 = arith.constant 0 : index
    %57 = vector.load %arg14[%c0_27, %c0_28, %c0_29] : memref<2x8x128xf32, #tpu.memory_space<vmem>>, vector<1x8x128xf32>
    %58 = vector.shape_cast %57 : vector<1x8x128xf32> to vector<8x128xf32>
    %59 = vector.shape_cast %31 : vector<8x128xf32> to vector<1x8x128xf32>
    tpu.vector_store %arg14[%c0_27, %c0_28, %c0_29], %59 {strides = array<i32>} : memref<2x8x128xf32, #tpu.memory_space<vmem>>, vector<1x8x128xf32>,
    %c0_30 = arith.constant 0 : index
    %c0_31 = arith.constant 0 : index
    %c0_32 = arith.constant 0 : index
    %60 = vector.load %arg15[%c0_30, %c0_31, %c0_32] : memref<2x8x128xf32, #tpu.memory_space<vmem>>, vector<1x8x128xf32>
    %61 = vector.shape_cast %60 : vector<1x8x128xf32> to vector<8x128xf32>
    %62 = vector.shape_cast %29 : vector<8x128xf32> to vector<1x8x128xf32>
    tpu.vector_store %arg15[%c0_30, %c0_31, %c0_32], %62 {strides = array<i32>} : memref<2x8x128xf32, #tpu.memory_space<vmem>>, vector<1x8x128xf32>,
    %c1_33 = arith.constant 1 : index
    %c0_34 = arith.constant 0 : index
    %c0_35 = arith.constant 0 : index
    %63 = vector.load %arg14[%c1_33, %c0_34, %c0_35] : memref<2x8x128xf32, #tpu.memory_space<vmem>>, vector<1x8x128xf32>
    %64 = vector.shape_cast %63 : vector<1x8x128xf32> to vector<8x128xf32>
    %65 = vector.shape_cast %56 : vector<8x128xf32> to vector<1x8x128xf32>
    tpu.vector_store %arg14[%c1_33, %c0_34, %c0_35], %65 {strides = array<i32>} : memref<2x8x128xf32, #tpu.memory_space<vmem>>, vector<1x8x128xf32>,
    %c1_36 = arith.constant 1 : index
    %c0_37 = arith.constant 0 : index
    %c0_38 = arith.constant 0 : index
    %66 = vector.load %arg15[%c1_36, %c0_37, %c0_38] : memref<2x8x128xf32, #tpu.memory_space<vmem>>, vector<1x8x128xf32>
    %67 = vector.shape_cast %66 : vector<1x8x128xf32> to vector<8x128xf32>
    %68 = vector.shape_cast %54 : vector<8x128xf32> to vector<1x8x128xf32>
    tpu.vector_store %arg15[%c1_36, %c0_37, %c0_38], %68 {strides = array<i32>} : memref<2x8x128xf32, #tpu.memory_space<vmem>>, vector<1x8x128xf32>,
    %c0_39 = arith.constant 0 : index
    %c0_40 = arith.constant 0 : index
    %69 = vector.load %arg11[%c0_39, %c0_40] : memref<128x128xf32, #tpu.memory_space<vmem>>, vector<128x128xf32>
    %cst_41 = arith.constant dense<0.000000e+00> : vector<8x128xf32>
    %70 = tpu.matmul %56, %69, %cst_41 {dimension_numbers = #tpu.dot_dimension_numbers<[1], [0], [0], [1], [0, 0, 1, 1], [], []>} : vector<8x128xf32>, vector<128x128xf32>, vector<8x128xf32> -> vector<8x128xf32>
    %c0_42 = arith.constant 0 : index
    %c0_43 = arith.constant 0 : index
    %71 = vector.load %arg12[%c0_42, %c0_43] : memref<1x128xf32, #tpu.memory_space<vmem>>, vector<1x128xf32>
    %72 = vector.broadcast %71 : vector<1x128xf32> to vector<8x128xf32>
    %73 = arith.addf %70, %72 : vector<8x128xf32>
    %c0_44 = arith.constant 0 : index
    %c0_45 = arith.constant 0 : index
    %c0_46 = arith.constant 0 : index
    %74 = vector.load %arg13[%c0_44, %c0_45, %c0_46] : memref<1x8x128xf32, #tpu.memory_space<vmem>>, vector<1x8x128xf32>
    %75 = vector.shape_cast %74 : vector<1x8x128xf32> to vector<8x128xf32>
    %76 = vector.shape_cast %73 : vector<8x128xf32> to vector<1x8x128xf32>
    tpu.vector_store %arg13[%c0_44, %c0_45, %c0_46], %76 {strides = array<i32>} : memref<1x8x128xf32, #tpu.memory_space<vmem>>, vector<1x8x128xf32>,
    %77 = tpu.iota {dimensions = array<i32: 1>} : vector<8x128xi32>
    %78 = arith.sitofp %77 : vector<8x128xi32> to vector<8x128xf32>
    %c24_i32 = arith.constant 24 : i32
    %79 = vector.broadcast %c24_i32 : i32 to vector<8x128xi32>
    %80 = arith.cmpi slt, %77, %79 : vector<8x128xi32>
    %cst_47 = arith.constant -1.000000e+30 : f32
    %81 = vector.broadcast %cst_47 : f32 to vector<8x128xf32>
    %82 = arith.select %80, %73, %81 : vector<8x128xi1>, vector<8x128xf32>
    %cst_48 = arith.constant dense<0xFF800000> : vector<8xf32>
    %83 = vector.multi_reduction <maximumf>, %82, %cst_48 [1] : vector<8x128xf32> to vector<8xf32>
    %84 = vector.shape_cast %83 : vector<8xf32> to vector<8x1xf32>
    %85 = vector.broadcast %84 : vector<8x1xf32> to vector<8x128xf32>
    %86 = arith.cmpf oeq, %82, %85 : vector<8x128xf32>
    %cst_49 = arith.constant 1.280000e+02 : f32
    %87 = vector.broadcast %cst_49 : f32 to vector<8x128xf32>
    %88 = arith.select %86, %78, %87 : vector<8x128xi1>, vector<8x128xf32>
    %cst_50 = arith.constant dense<0x7F800000> : vector<8xf32>
    %89 = vector.multi_reduction <minimumf>, %88, %cst_50 [1] : vector<8x128xf32> to vector<8xf32>
    %90 = vector.shape_cast %89 : vector<8xf32> to vector<8x1xf32>
    %91 = vector.broadcast %90 : vector<8x1xf32> to vector<8x128xf32>
    %92 = arith.cmpf oeq, %78, %91 : vector<8x128xf32>
    %93 = arith.extui %92 : vector<8x128xi1> to vector<8x128xi32>
    %94 = arith.sitofp %93 : vector<8x128xi32> to vector<8x128xf32>
    %95 = arith.index_cast %0 : i32 to index
    %96 = memref.load %arg1[%95] : memref<8xi32, #tpu.memory_space<smem>>
    %c0_i32_51 = arith.constant 0 : i32
    %97 = arith.cmpi sgt, %96, %c0_i32_51 : i32
    %98 = arith.extui %97 : i1 to i32
    %99 = arith.sitofp %98 : i32 to f32
    %c0_52 = arith.constant 0 : index
    %c0_53 = arith.constant 0 : index
    %c0_54 = arith.constant 0 : index
    %100 = vector.load %arg3[%c0_52, %c0_53, %c0_54] : memref<1x8x128xf32, #tpu.memory_space<vmem>>, vector<1x8x128xf32>
    %101 = vector.shape_cast %100 : vector<1x8x128xf32> to vector<8x128xf32>
    %102 = vector.broadcast %99 : f32 to vector<8x128xf32>
    %103 = arith.mulf %102, %101 : vector<8x128xf32>
    %cst_55 = arith.constant 1.000000e+00 : f32
    %104 = arith.subf %cst_55, %99 : f32
    %105 = vector.broadcast %104 : f32 to vector<8x128xf32>
    %106 = arith.mulf %105, %94 : vector<8x128xf32>
    %107 = arith.addf %103, %106 : vector<8x128xf32>
    %c0_56 = arith.constant 0 : index
    %c0_57 = arith.constant 0 : index
    %108 = vector.load %arg16[%c0_56, %c0_57] : memref<8x128xf32, #tpu.memory_space<vmem>>, vector<8x128xf32>
    tpu.vector_store %arg16[%c0_56, %c0_57], %107 {strides = array<i32>} : memref<8x128xf32, #tpu.memory_space<vmem>>, vector<8x128xf32>,
    return
  }
  func.func @transform_0(%arg0: i32, %arg1: memref<8xi32, #tpu.memory_space<smem>>) -> (i32, i32, i32) {
    %c0_i32 = arith.constant 0 : i32
    %c0_i32_0 = arith.constant 0 : i32
    %c0_i32_1 = arith.constant 0 : i32
    %c0_i32_2 = arith.constant 0 : i32
    return %c0_i32, %c0_i32_0, %c0_i32_1 : i32, i32, i32
  }
  func.func @transform_1(%arg0: i32, %arg1: memref<8xi32, #tpu.memory_space<smem>>) -> (i32, i32, i32) {
    %c1_i32 = arith.constant 1 : i32
    %0 = arith.addi %arg0, %c1_i32 : i32
    %c0_i32 = arith.constant 0 : i32
    %c0_i32_0 = arith.constant 0 : i32
    %c0_i32_1 = arith.constant 0 : i32
    return %0, %c0_i32, %c0_i32_0 : i32, i32, i32
  }
  func.func @transform_2(%arg0: i32, %arg1: memref<8xi32, #tpu.memory_space<smem>>) -> (i32, i32, i32) {
    %c0_i32 = arith.constant 0 : i32
    %c0_i32_0 = arith.constant 0 : i32
    %c0_i32_1 = arith.constant 0 : i32
    %c0_i32_2 = arith.constant 0 : i32
    return %c0_i32, %c0_i32_0, %c0_i32_1 : i32, i32, i32
  }
  func.func @transform_3(%arg0: i32, %arg1: memref<8xi32, #tpu.memory_space<smem>>) -> (i32, i32, i32) {
    %c0_i32 = arith.constant 0 : i32
    %c0_i32_0 = arith.constant 0 : i32
    %c0_i32_1 = arith.constant 0 : i32
    %c0_i32_2 = arith.constant 0 : i32
    return %c0_i32, %c0_i32_0, %c0_i32_1 : i32, i32, i32
  }
  func.func @transform_4(%arg0: i32, %arg1: memref<8xi32, #tpu.memory_space<smem>>) -> (i32, i32) {
    %c0_i32 = arith.constant 0 : i32
    %c0_i32_0 = arith.constant 0 : i32
    %c0_i32_1 = arith.constant 0 : i32
    return %c0_i32, %c0_i32_0 : i32, i32
  }
  func.func @transform_5(%arg0: i32, %arg1: memref<8xi32, #tpu.memory_space<smem>>) -> (i32, i32) {
    %c0_i32 = arith.constant 0 : i32
    %c0_i32_0 = arith.constant 0 : i32
    %c0_i32_1 = arith.constant 0 : i32
    return %c0_i32, %c0_i32_0 : i32, i32
  }
  func.func @transform_6(%arg0: i32, %arg1: memref<8xi32, #tpu.memory_space<smem>>) -> (i32, i32) {
    %c0_i32 = arith.constant 0 : i32
    %c0_i32_0 = arith.constant 0 : i32
    %c0_i32_1 = arith.constant 0 : i32
    return %c0_i32, %c0_i32_0 : i32, i32
  }
  func.func @transform_7(%arg0: i32, %arg1: memref<8xi32, #tpu.memory_space<smem>>) -> (i32, i32) {
    %c0_i32 = arith.constant 0 : i32
    %c0_i32_0 = arith.constant 0 : i32
    %c0_i32_1 = arith.constant 0 : i32
    return %c0_i32, %c0_i32_0 : i32, i32
  }
  func.func @transform_8(%arg0: i32, %arg1: memref<8xi32, #tpu.memory_space<smem>>) -> (i32, i32) {
    %c0_i32 = arith.constant 0 : i32
    %c0_i32_0 = arith.constant 0 : i32
    %c0_i32_1 = arith.constant 0 : i32
    return %c0_i32, %c0_i32_0 : i32, i32
  }
  func.func @transform_9(%arg0: i32, %arg1: memref<8xi32, #tpu.memory_space<smem>>) -> (i32, i32) {
    %c0_i32 = arith.constant 0 : i32
    %c0_i32_0 = arith.constant 0 : i32
    %c0_i32_1 = arith.constant 0 : i32
    return %c0_i32, %c0_i32_0 : i32, i32
  }
  func.func @transform_10(%arg0: i32, %arg1: memref<8xi32, #tpu.memory_space<smem>>) -> (i32, i32) {
    %c0_i32 = arith.constant 0 : i32
    %c0_i32_0 = arith.constant 0 : i32
    %c0_i32_1 = arith.constant 0 : i32
    return %c0_i32, %c0_i32_0 : i32, i32
  }
  func.func @transform_11(%arg0: i32, %arg1: memref<8xi32, #tpu.memory_space<smem>>) -> (i32, i32, i32) {
    %c0_i32 = arith.constant 0 : i32
    %c0_i32_0 = arith.constant 0 : i32
    %c0_i32_1 = arith.constant 0 : i32
    return %arg0, %c0_i32, %c0_i32_0 : i32, i32, i32
  }
}

</mosaic_0001>

<bundles_post_ra>
// kernel: encoder_decoder_forward.2
= control target key start
LH: loop header
LB: loop body
LE: loop exit
PB: predicated region body
PF: predicated region fallthrough
CT: control target
= control target key end

     0   :  { %12 = vsyncpa [#allocation3], 0  ;;  %s1276_s0 = inlined_call_operand.vmem [shape: f32[10,8,128], index: 0, kind: input, shape index: {}]   ;;  %s1277_s1 = inlined_call_operand.hbm [shape: f32[256,512], index: 1, kind: input, shape index: {}]   ;;  %s1278_s2 = inlined_call_operand.vmem [shape: f32[1,512], index: 2, kind: input, shape index: {}]   ;;  %s1279_s3 = inlined_call_operand.hbm [shape: f32[256,512], index: 3, kind: input, shape index: {}]   ;;  %s1280_s4 = inlined_call_operand.vmem [shape: f32[1,512], index: 4, kind: input, shape index: {}]   ;;  %s1281_s5 = inlined_call_operand.vmem [shape: f32[2,8,128], index: 5, kind: output, shape index: {0}]   ;;  %s1282_s6 = inlined_call_operand.vmem [shape: f32[2,8,128], index: 6, kind: output, shape index: {1}]  }
   0x1   :  { %13 = vsyncpa [#allocation5], 0  ;;  %s1163_s21 = smov 0  }
   0x2 LB: > { %s1169_s22 = sadd.s32 4294967295, %s1121_s21   ;;  %p970_p0 = scmp.ge.s32.totalorder %s1121_s21, 1  ;;  %s1121_s21 = sphi %s1163_s21, %s19_s21  }
   0x3   : > { %p176_p1 = scmp.lt.s32.totalorder %s1121_s21, 11  ;;  %s1123_s23 = smov [#allocation2]  }
   0x4   : > { %s188_s24 = sshll.u32 %s1123_s23, 4  ;;  %p1006_p4 = scmp.eq.s32.totalorder %s1169_s22, 0  ;;  %s189_s24 = int_to_ptr.vmem [resolvable:$true] %s188_s24 }
   0x5   : > { %p1174_p3 = pnand %p970_p0, %p176_p1  ;;  %s1124_s26 = smov [#allocation4]  }
   0x6   : > { %s204_s27 = sshll.u32 %s1124_s26, 4  ;;  %s1066_s29 = scalar_lea.vmem %s189_s24, 16384  ;;  %s205_s27 = int_to_ptr.vmem [resolvable:$true] %s204_s27 }
   0x7   : > { %p999_p5 = pneg %p1174_p3  ;;  %p1067_p8 = scmp.ne.s32.totalorder %s189_s24, %s1066_s29 }
   0x8   : > { %p1074_p11 = scmp.lt.s32.totalorder %s189_s24, %s189_s24  ;;  %p1075_p12 = scmp.lt.s32.totalorder %s1066_s29, %s1066_s29 }
   0x9   : > { %p1183_p6 = pnand %p1006_p4, %p999_p5 }
   0xa   : > { %p1076_p13 = por %p1075_p12, %p1074_p11 }
   0xb   : > { %p1057_p7 = pneg %p1183_p6 }
   0xd   : > { %p1069_p9 = pnand %p1067_p8, %p1057_p7 }
   0xf   : > { %p1070_p10 = pneg %p1069_p9 }
  0x11   : > { %p1077_p0 = pnand %p1076_p13, %p1070_p10 }
  0x13   : > { %1080 = shalt.err (!%p1077_p0)
}
  0x14   : > { %s1125_s30 = smov 512   ;;  %s1126_s7 = smov 32  }
  0x15   : > { %1002 = dma.hbm_to_vmem [thread:$0]  (!%p1183_p6), %s1277_s1, 16384, %s189_s24, [#allocation3], %s1125_s30, %s1125_s30, %s1126_s7  }
  0x16   : > { %s1092_s10 = scalar_lea.vmem %s205_s27, 16384  ;;  %p1100_p9 = scmp.lt.s32.totalorder %s205_s27, %s205_s27 }
  0x17   : > { %p1093_p1 = scmp.ne.s32.totalorder %s205_s27, %s1092_s10  ;;  %p1101_p2 = scmp.lt.s32.totalorder %s1092_s10, %s1092_s10 }
  0x19   : > { %p1095_p5 = pnand %p1093_p1, %p1057_p7  ;;  %p1102_p11 = por %p1101_p2, %p1100_p9 }
  0x1b   : > { %p1096_p8 = pneg %p1095_p5 }
  0x1d   : > { %p1103_p10 = pnand %p1102_p11, %p1096_p8 }
  0x1f   : > { %1106 = shalt.err (!%p1103_p10)
}
  0x20   : > { %1005 = dma.hbm_to_vmem [thread:$0]  (!%p1183_p6), %s1279_s3, 16384, %s205_s27, [#allocation5], %s1125_s30, %s1125_s30, %s1126_s7  }
  0x21   : > { %230 = sbr.rel (%p1174_p3) target bundleno = 616 (0x268), region = 40 }
  0x26   : > { %1112 = dma.done.wait (%p1006_p4), [#allocation3], 16384  }
  0x27   : > { %1114 = vsyncadd (%p1006_p4), [#allocation3], 4294950912 }
  0x28   : > { %1116 = dma.done.wait (%p1006_p4), [#allocation5], 16384  }
  0x29   : > { %1118 = vsyncadd (%p1006_p4), [#allocation5], 4294950912  ;;  %p258_p2 = scmp.lt.s32.totalorder %s1169_s22, 9  ;;  %p1285_p3 = scmp.ne.s32.totalorder %s1169_s22, 0 }
  0x2b   : > { %s259_s13 = scalar_select %p258_p2, %s1169_s22, 9 }
  0x2c   : > { %265 = sbr.rel (%p1285_p3) target bundleno = 52 (0x34), region = 52 }
  0x2d   : > { %s977_s14 = sshll.u32 %s259_s13, 3 }
  0x2e   : > { %s1220_s17 = scalar_lea.vmem %s1276_s0, %s977_s14 }
  0x31   : > { %v1127_v0 = vmov 0.0  }
  0x32   : > { %266 = vst [vmem:[%s1281_s5] sm:$0xff] %v1127_v0  ;;  %267 = vst [vmem:[%s1281_s5 + $0x8] sm:$0xff] %v1127_v0 }
  0x33   : > { %268 = vst [vmem:[%s1282_s6] sm:$0xff] %v1127_v0  ;;  %269 = vst [vmem:[%s1282_s6 + $0x8] sm:$0xff] %v1127_v0 }
  0x34 PF: > { %v334_v1 = vld [vmem:[#allocation2 + $0x1e8] sm:$0xff]  ;;  %v333_v2 = vld [vmem:[#allocation2 + $0x1e0] sm:$0xff]  ;;  %v336_v9 = vld [vmem:[#allocation2 + $0x1f8] sm:$0xff] }
  0x35   : > { %v330_v3 = vld [vmem:[#allocation2 + $0x1c8] sm:$0xff]  ;;  %423 = vmatprep.subr.mxu0 %v334_v1  ;;  %v329_v4 = vld [vmem:[#allocation2 + $0x1c0] sm:$0xff]  ;;  %494 = vmatprep.subr.mxu1 %v336_v9  ;;  %v335_v11 = vld [vmem:[#allocation2 + $0x1f0] sm:$0xff] }
  0x36   : > { %424 = vmatpush1.msra.mxu0 %v333_v2  ;;  %v326_v5 = vld [vmem:[#allocation2 + $0x1a8] sm:$0xff]  ;;  %v325_v6 = vld [vmem:[#allocation2 + $0x1a0] sm:$0xff]  ;;  %495 = vmatpush1.msra.mxu1 %v335_v11  ;;  %v332_v13 = vld [vmem:[#allocation2 + $0x1d8] sm:$0xff] }
  0x37   : > { %425 = vmatprep.subr.mxu0 %v330_v3  ;;  %v322_v7 = vld [vmem:[#allocation2 + $0x188] sm:$0xff]  ;;  %v321_v8 = vld [vmem:[#allocation2 + $0x180] sm:$0xff]  ;;  %v331_v14 = vld [vmem:[#allocation2 + $0x1d0] sm:$0xff]  ;;  %496 = vmatprep.subr.mxu1 %v332_v13 }
  0x38   : > { %426 = vmatpush1.msra.mxu0 %v329_v4  ;;  %v318_v10 = vld [vmem:[#allocation2 + $0x168] sm:$0xff]  ;;  %v317_v12 = vld [vmem:[#allocation2 + $0x160] sm:$0xff]  ;;  %v328_v16 = vld [vmem:[#allocation2 + $0x1b8] sm:$0xff]  ;;  %497 = vmatpush1.msra.mxu1 %v331_v14 }
  0x39   : > { %427 = vmatprep.subr.mxu0 %v326_v5  ;;  %v314_v15 = vld [vmem:[#allocation2 + $0x148] sm:$0xff]  ;;  %v313_v17 = vld [vmem:[#allocation2 + $0x140] sm:$0xff]  ;;  %v327_v18 = vld [vmem:[#allocation2 + $0x1b0] sm:$0xff]  ;;  %498 = vmatprep.subr.mxu1 %v328_v16 }
  0x3a   : > { %428 = vmatpush1.msra.mxu0 %v325_v6  ;;  %v324_v19 = vld [vmem:[#allocation2 + $0x198] sm:$0xff]  ;;  %v310_v20 = vld [vmem:[#allocation2 + $0x128] sm:$0xff]  ;;  %v323_v21 = vld [vmem:[#allocation2 + $0x190] sm:$0xff]  ;;  %499 = vmatpush1.msra.mxu1 %v327_v18 }
  0x3b   : > { %429 = vmatprep.subr.mxu0 %v322_v7  ;;  %v309_v22 = vld [vmem:[#allocation2 + $0x120] sm:$0xff]  ;;  %v320_v23 = vld [vmem:[#allocation2 + $0x178] sm:$0xff]  ;;  %v306_v24 = vld [vmem:[#allocation2 + $0x108] sm:$0xff]  ;;  %500 = vmatprep.subr.mxu1 %v324_v19 }
  0x3c   : > { %430 = vmatpush1.msra.mxu0 %v321_v8  ;;  %v319_v25 = vld [vmem:[#allocation2 + $0x170] sm:$0xff]  ;;  %v305_v26 = vld [vmem:[#allocation2 + $0x100] sm:$0xff]  ;;  %501 = vmatpush1.msra.mxu1 %v323_v21  ;;  %v316_v27 = vld [vmem:[#allocation2 + $0x158] sm:$0xff] }
  0x3d   : > { %431 = vmatprep.subr.mxu0 %v318_v10  ;;  %v302_v28 = vld [vmem:[#allocation2 + $0xe8] sm:$0xff]  ;;  %502 = vmatprep.subr.mxu1 %v320_v23  ;;  %v315_v29 = vld [vmem:[#allocation2 + $0x150] sm:$0xff]  ;;  %v301_v30 = vld [vmem:[#allocation2 + $0xe0] sm:$0xff] }
  0x3e   : > { %432 = vmatpush1.msra.mxu0 %v317_v12  ;;  %503 = vmatpush1.msra.mxu1 %v319_v25  ;;  %v312_v31 = vld [vmem:[#allocation2 + $0x138] sm:$0xff]  ;;  %v298_v32 = vld [vmem:[#allocation2 + $0xc8] sm:$0xff]  ;;  %v311_v33 = vld [vmem:[#allocation2 + $0x130] sm:$0xff] }
  0x3f   : > { %433 = vmatprep.subr.mxu0 %v314_v15  ;;  %504 = vmatprep.subr.mxu1 %v316_v27  ;;  %v297_v34 = vld [vmem:[#allocation2 + $0xc0] sm:$0xff]  ;;  %v308_v35 = vld [vmem:[#allocation2 + $0x118] sm:$0xff]  ;;  %v294_v36 = vld [vmem:[#allocation2 + $0xa8] sm:$0xff] }
  0x40   : > { %434 = vmatpush1.msra.mxu0 %v313_v17  ;;  %505 = vmatpush1.msra.mxu1 %v315_v29  ;;  %v307_v37 = vld [vmem:[#allocation2 + $0x110] sm:$0xff]  ;;  %v293_v38 = vld [vmem:[#allocation2 + $0xa0] sm:$0xff]  ;;  %v304_v39 = vld [vmem:[#allocation2 + $0xf8] sm:$0xff] }
  0x41   : > { %435 = vmatprep.subr.mxu0 %v310_v20  ;;  %506 = vmatprep.subr.mxu1 %v312_v31  ;;  %v290_v40 = vld [vmem:[#allocation2 + $0x88] sm:$0xff]  ;;  %v303_v41 = vld [vmem:[#allocation2 + $0xf0] sm:$0xff]  ;;  %v289_v42 = vld [vmem:[#allocation2 + $0x80] sm:$0xff] }
  0x42   : > { %436 = vmatpush1.msra.mxu0 %v309_v22  ;;  %507 = vmatpush1.msra.mxu1 %v311_v33  ;;  %v300_v43 = vld [vmem:[#allocation2 + $0xd8] sm:$0xff]  ;;  %v286_v44 = vld [vmem:[#allocation2 + $0x68] sm:$0xff]  ;;  %v299_v45 = vld [vmem:[#allocation2 + $0xd0] sm:$0xff] }
  0x43   : > { %437 = vmatprep.subr.mxu0 %v306_v24  ;;  %508 = vmatprep.subr.mxu1 %v308_v35  ;;  %v285_v46 = vld [vmem:[#allocation2 + $0x60] sm:$0xff]  ;;  %v296_v47 = vld [vmem:[#allocation2 + $0xb8] sm:$0xff]  ;;  %v282_v48 = vld [vmem:[#allocation2 + $0x48] sm:$0xff] }
  0x44   : > { %438 = vmatpush1.msra.mxu0 %v305_v26  ;;  %509 = vmatpush1.msra.mxu1 %v307_v37  ;;  %v295_v49 = vld [vmem:[#allocation2 + $0xb0] sm:$0xff]  ;;  %v281_v50 = vld [vmem:[#allocation2 + $0x40] sm:$0xff]  ;;  %v292_v51 = vld [vmem:[#allocation2 + $0x98] sm:$0xff] }
  0x45   : > { %439 = vmatprep.subr.mxu0 %v302_v28  ;;  %510 = vmatprep.subr.mxu1 %v304_v39  ;;  %v278_v52 = vld [vmem:[#allocation2 + $0x28] sm:$0xff]  ;;  %v291_v53 = vld [vmem:[#allocation2 + $0x90] sm:$0xff]  ;;  %v277_v54 = vld [vmem:[#allocation2 + $0x20] sm:$0xff] }
  0x46   : > { %440 = vmatpush1.msra.mxu0 %v301_v30  ;;  %511 = vmatpush1.msra.mxu1 %v303_v41  ;;  %v288_v55 = vld [vmem:[#allocation2 + $0x78] sm:$0xff]  ;;  %v274_v56 = vld [vmem:[#allocation2 + $0x8] sm:$0xff]  ;;  %v287_v57 = vld [vmem:[#allocation2 + $0x70] sm:$0xff] }
  0x47   : > { %441 = vmatprep.subr.mxu0 %v298_v32  ;;  %512 = vmatprep.subr.mxu1 %v300_v43  ;;  %v273_v58 = vld [vmem:[#allocation2] sm:$0xff]  ;;  %v284_v59 = vld [vmem:[#allocation2 + $0x58] sm:$0xff]  ;;  %v398_v60 = vld [vmem:[#allocation2 + $0x3e8] sm:$0xff] }
  0x48   : > { %442 = vmatpush1.msra.mxu0 %v297_v34  ;;  %513 = vmatpush1.msra.mxu1 %v299_v45  ;;  %v283_v61 = vld [vmem:[#allocation2 + $0x50] sm:$0xff]  ;;  %v397_v62 = vld [vmem:[#allocation2 + $0x3e0] sm:$0xff]  ;;  %v280_v63 = vld [vmem:[#allocation2 + $0x38] sm:$0xff] }
  0x49   : > { %443 = vmatprep.subr.mxu0 %v294_v36  ;;  %514 = vmatprep.subr.mxu1 %v296_v47  ;;  %v394_v0 = vld [vmem:[#allocation2 + $0x3c8] sm:$0xff]  ;;  %v279_v1 = vld [vmem:[#allocation2 + $0x30] sm:$0xff]  ;;  %v393_v2 = vld [vmem:[#allocation2 + $0x3c0] sm:$0xff] }
  0x4a   : > { %444 = vmatpush1.msra.mxu0 %v293_v38  ;;  %515 = vmatpush1.msra.mxu1 %v295_v49  ;;  %v276_v3 = vld [vmem:[#allocation2 + $0x18] sm:$0xff]  ;;  %v390_v4 = vld [vmem:[#allocation2 + $0x3a8] sm:$0xff]  ;;  %v275_v5 = vld [vmem:[#allocation2 + $0x10] sm:$0xff] }
  0x4b   : > { %445 = vmatprep.subr.mxu0 %v290_v40  ;;  %516 = vmatprep.subr.mxu1 %v292_v51  ;;  %v389_v6 = vld [vmem:[#allocation2 + $0x3a0] sm:$0xff]  ;;  %v400_v7 = vld [vmem:[#allocation2 + $0x3f8] sm:$0xff]  ;;  %v386_v8 = vld [vmem:[#allocation2 + $0x388] sm:$0xff] }
  0x4c   : > { %446 = vmatpush1.msra.mxu0 %v289_v42  ;;  %517 = vmatpush1.msra.mxu1 %v291_v53  ;;  %v399_v9 = vld [vmem:[#allocation2 + $0x3f0] sm:$0xff]  ;;  %v385_v10 = vld [vmem:[#allocation2 + $0x380] sm:$0xff]  ;;  %v396_v11 = vld [vmem:[#allocation2 + $0x3d8] sm:$0xff] }
  0x4d   : > { %447 = vmatprep.subr.mxu0 %v286_v44  ;;  %518 = vmatprep.subr.mxu1 %v288_v55  ;;  %v382_v12 = vld [vmem:[#allocation2 + $0x368] sm:$0xff]  ;;  %v395_v13 = vld [vmem:[#allocation2 + $0x3d0] sm:$0xff]  ;;  %v381_v14 = vld [vmem:[#allocation2 + $0x360] sm:$0xff] }
  0x4e   : > { %448 = vmatpush1.msra.mxu0 %v285_v46  ;;  %519 = vmatpush1.msra.mxu1 %v287_v57  ;;  %v392_v15 = vld [vmem:[#allocation2 + $0x3b8] sm:$0xff]  ;;  %v378_v16 = vld [vmem:[#allocation2 + $0x348] sm:$0xff]  ;;  %v391_v17 = vld [vmem:[#allocation2 + $0x3b0] sm:$0xff] }
  0x4f   : > { %449 = vmatprep.subr.mxu0 %v282_v48  ;;  %520 = vmatprep.subr.mxu1 %v284_v59  ;;  %v377_v18 = vld [vmem:[#allocation2 + $0x340] sm:$0xff]  ;;  %v388_v19 = vld [vmem:[#allocation2 + $0x398] sm:$0xff]  ;;  %v374_v20 = vld [vmem:[#allocation2 + $0x328] sm:$0xff] }
  0x50   : > { %450 = vmatpush1.msra.mxu0 %v281_v50  ;;  %521 = vmatpush1.msra.mxu1 %v283_v61  ;;  %v387_v21 = vld [vmem:[#allocation2 + $0x390] sm:$0xff]  ;;  %v373_v22 = vld [vmem:[#allocation2 + $0x320] sm:$0xff]  ;;  %v384_v23 = vld [vmem:[#allocation2 + $0x378] sm:$0xff] }
  0x51   : > { %451 = vmatprep.subr.mxu0 %v278_v52  ;;  %522 = vmatprep.subr.mxu1 %v280_v63  ;;  %v370_v24 = vld [vmem:[#allocation2 + $0x308] sm:$0xff]  ;;  %v383_v25 = vld [vmem:[#allocation2 + $0x370] sm:$0xff]  ;;  %v369_v26 = vld [vmem:[#allocation2 + $0x300] sm:$0xff] }
  0x52   : > { %452 = vmatpush1.msra.mxu0 %v277_v54  ;;  %523 = vmatpush1.msra.mxu1 %v279_v1  ;;  %v380_v27 = vld [vmem:[#allocation2 + $0x358] sm:$0xff]  ;;  %v366_v28 = vld [vmem:[#allocation2 + $0x2e8] sm:$0xff]  ;;  %v379_v29 = vld [vmem:[#allocation2 + $0x350] sm:$0xff] }
  0x53   : > { %453 = vmatprep.subr.mxu0 %v274_v56  ;;  %524 = vmatprep.subr.mxu1 %v276_v3  ;;  %v365_v30 = vld [vmem:[#allocation2 + $0x2e0] sm:$0xff]  ;;  %v376_v31 = vld [vmem:[#allocation2 + $0x338] sm:$0xff]  ;;  %v362_v32 = vld [vmem:[#allocation2 + $0x2c8] sm:$0xff] }
  0x54   : > { %454 = vmatpush1.msra.mxu0 %v273_v58  ;;  %525 = vmatpush1.msra.mxu1 %v275_v5  ;;  %v375_v33 = vld [vmem:[#allocation2 + $0x330] sm:$0xff]  ;;  %v361_v34 = vld [vmem:[#allocation2 + $0x2c0] sm:$0xff]  ;;  %v372_v35 = vld [vmem:[#allocation2 + $0x318] sm:$0xff] }
  0x55   : > { %455 = vmatprep.subr.mxu0 %v398_v60  ;;  %526 = vmatprep.subr.mxu1 %v400_v7  ;;  %v358_v36 = vld [vmem:[#allocation2 + $0x2a8] sm:$0xff]  ;;  %v271_v37 = vld [vmem:[%s1281_s5] sm:$0xff]  ;;  %v371_v39 = vld [vmem:[#allocation2 + $0x310] sm:$0xff] }
  0x56   : > { %456 = vmatpush2.msra.mxu0 %v397_v62  ;;  %527 = vmatpush2.msra.mxu1 %v399_v9  ;;  %v357_v38 = vld [vmem:[#allocation2 + $0x2a0] sm:$0xff]  ;;  %v354_v40 = vld [vmem:[#allocation2 + $0x288] sm:$0xff]  ;;  %v368_v41 = vld [vmem:[#allocation2 + $0x2f8] sm:$0xff] }
  0x57   : > { %457 = vmatprep.subr.mxu0 %v394_v0  ;;  %528 = vmatprep.subr.mxu1 %v396_v11  ;;  %v353_v42 = vld [vmem:[#allocation2 + $0x280] sm:$0xff]  ;;  %v367_v43 = vld [vmem:[#allocation2 + $0x2f0] sm:$0xff]  ;;  %v350_v44 = vld [vmem:[#allocation2 + $0x268] sm:$0xff] }
  0x58   : > { %458 = vmatpush2.msra.mxu0 %v393_v2  ;;  %529 = vmatpush2.msra.mxu1 %v395_v13  ;;  %v364_v45 = vld [vmem:[#allocation2 + $0x2d8] sm:$0xff]  ;;  %v349_v46 = vld [vmem:[#allocation2 + $0x260] sm:$0xff]  ;;  %v363_v47 = vld [vmem:[#allocation2 + $0x2d0] sm:$0xff] }
  0x59   : > { %459 = vmatprep.subr.mxu0 %v390_v4  ;;  %530 = vmatprep.subr.mxu1 %v392_v15  ;;  %v346_v48 = vld [vmem:[#allocation2 + $0x248] sm:$0xff]  ;;  %v360_v49 = vld [vmem:[#allocation2 + $0x2b8] sm:$0xff]  ;;  %v345_v50 = vld [vmem:[#allocation2 + $0x240] sm:$0xff] }
  0x5a   : > { %460 = vmatpush2.msra.mxu0 %v389_v6  ;;  %531 = vmatpush2.msra.mxu1 %v391_v17  ;;  %v359_v51 = vld [vmem:[#allocation2 + $0x2b0] sm:$0xff]  ;;  %v342_v52 = vld [vmem:[#allocation2 + $0x228] sm:$0xff]  ;;  %v356_v53 = vld [vmem:[#allocation2 + $0x298] sm:$0xff] }
  0x5b   : > { %461 = vmatprep.subr.mxu0 %v386_v8  ;;  %532 = vmatprep.subr.mxu1 %v388_v19  ;;  %v341_v54 = vld [vmem:[#allocation2 + $0x220] sm:$0xff]  ;;  %v355_v55 = vld [vmem:[#allocation2 + $0x290] sm:$0xff]  ;;  %v338_v56 = vld [vmem:[#allocation2 + $0x208] sm:$0xff] }
  0x5c   : > { %462 = vmatpush2.msra.mxu0 %v385_v10  ;;  %533 = vmatpush2.msra.mxu1 %v387_v21  ;;  %v352_v57 = vld [vmem:[#allocation2 + $0x278] sm:$0xff]  ;;  %v337_v58 = vld [vmem:[#allocation2 + $0x200] sm:$0xff]  ;;  %v351_v59 = vld [vmem:[#allocation2 + $0x270] sm:$0xff] }
  0x5d   : > { %463 = vmatprep.subr.mxu0 %v382_v12  ;;  %534 = vmatprep.subr.mxu1 %v384_v23  ;;  %v270_v60 = vld [vmem:[%s1220_s17] sm:$0xff]  ;;  %v348_v61 = vld [vmem:[#allocation2 + $0x258] sm:$0xff]  ;;  %v347_v62 = vld [vmem:[#allocation2 + $0x250] sm:$0xff] }
  0x5e   : > { %464 = vmatpush2.msra.mxu0 %v381_v14  ;;  %535 = vmatpush2.msra.mxu1 %v383_v25  ;;  %v344_v63 = vld [vmem:[#allocation2 + $0x238] sm:$0xff]  ;;  %v654_v0 = vld [vmem:[#allocation4 + $0x1e8] sm:$0xff]  ;;  %v343_v1 = vld [vmem:[#allocation2 + $0x230] sm:$0xff] }
  0x5f   : > { %465 = vmatprep.subr.mxu0 %v378_v16  ;;  %536 = vmatprep.subr.mxu1 %v380_v27  ;;  %v653_v2 = vld [vmem:[#allocation4 + $0x1e0] sm:$0xff]  ;;  %v340_v3 = vld [vmem:[#allocation2 + $0x218] sm:$0xff]  ;;  %v650_v4 = vld [vmem:[#allocation4 + $0x1c8] sm:$0xff] }
  0x60   : > { %466 = vmatpush2.msra.mxu0 %v377_v18  ;;  %537 = vmatpush2.msra.mxu1 %v379_v29  ;;  %v339_v5 = vld [vmem:[#allocation2 + $0x210] sm:$0xff]  ;;  %v649_v6 = vld [vmem:[#allocation4 + $0x1c0] sm:$0xff]  ;;  %v656_v7 = vld [vmem:[#allocation4 + $0x1f8] sm:$0xff] }
  0x61   : > { %467 = vmatprep.subr.mxu0 %v374_v20  ;;  %538 = vmatprep.subr.mxu1 %v376_v31  ;;  %v655_v8 = vld [vmem:[#allocation4 + $0x1f0] sm:$0xff]  ;;  %v646_v9 = vld [vmem:[#allocation4 + $0x1a8] sm:$0xff]  ;;  %v652_v10 = vld [vmem:[#allocation4 + $0x1d8] sm:$0xff] }
  0x62   : > { %468 = vmatpush2.msra.mxu0 %v373_v22  ;;  %539 = vmatpush2.msra.mxu1 %v375_v33  ;;  %v645_v11 = vld [vmem:[#allocation4 + $0x1a0] sm:$0xff]  ;;  %v651_v12 = vld [vmem:[#allocation4 + $0x1d0] sm:$0xff]  ;;  %v642_v13 = vld [vmem:[#allocation4 + $0x188] sm:$0xff] }
  0x63   : > { %469 = vmatprep.subr.mxu0 %v370_v24  ;;  %540 = vmatprep.subr.mxu1 %v372_v35  ;;  %v648_v14 = vld [vmem:[#allocation4 + $0x1b8] sm:$0xff]  ;;  %v647_v15 = vld [vmem:[#allocation4 + $0x1b0] sm:$0xff]  ;;  %v641_v17 = vld [vmem:[#allocation4 + $0x180] sm:$0xff] }
  0x64   : > { %470 = vmatpush2.msra.mxu0 %v369_v26  ;;  %487 = vmatprep.mubr.f32.mxu0 %v271_v37  ;;  %v644_v16 = vld [vmem:[#allocation4 + $0x198] sm:$0xff]  ;;  %v643_v18 = vld [vmem:[#allocation4 + $0x190] sm:$0xff]  ;;  %v638_v19 = vld [vmem:[#allocation4 + $0x168] sm:$0xff] }
  0x65   : > { %471 = vmatprep.subr.mxu0 %v366_v28  ;;  %541 = vmatpush2.msra.mxu1 %v371_v39  ;;  %v640_v20 = vld [vmem:[#allocation4 + $0x178] sm:$0xff]  ;;  %v637_v21 = vld [vmem:[#allocation4 + $0x160] sm:$0xff]  ;;  %v639_v22 = vld [vmem:[#allocation4 + $0x170] sm:$0xff] }
  0x66   : > { %472 = vmatpush2.msra.mxu0 %v365_v30  ;;  %542 = vmatprep.subr.mxu1 %v368_v41  ;;  %v634_v23 = vld [vmem:[#allocation4 + $0x148] sm:$0xff]  ;;  %v636_v24 = vld [vmem:[#allocation4 + $0x158] sm:$0xff]  ;;  %v633_v25 = vld [vmem:[#allocation4 + $0x140] sm:$0xff] }
  0x67   : > { %473 = vmatprep.subr.mxu0 %v362_v32  ;;  %543 = vmatpush2.msra.mxu1 %v367_v43  ;;  %v635_v26 = vld [vmem:[#allocation4 + $0x150] sm:$0xff]  ;;  %v630_v27 = vld [vmem:[#allocation4 + $0x128] sm:$0xff]  ;;  %v632_v28 = vld [vmem:[#allocation4 + $0x138] sm:$0xff] }
  0x68   : > { %474 = vmatpush2.msra.mxu0 %v361_v34  ;;  %544 = vmatprep.subr.mxu1 %v364_v45  ;;  %v629_v29 = vld [vmem:[#allocation4 + $0x120] sm:$0xff]  ;;  %v631_v30 = vld [vmem:[#allocation4 + $0x130] sm:$0xff]  ;;  %v626_v31 = vld [vmem:[#allocation4 + $0x108] sm:$0xff] }
  0x69   : > { %475 = vmatprep.subr.mxu0 %v358_v36  ;;  %545 = vmatpush2.msra.mxu1 %v363_v47  ;;  %v628_v32 = vld [vmem:[#allocation4 + $0x118] sm:$0xff]  ;;  %v625_v33 = vld [vmem:[#allocation4 + $0x100] sm:$0xff]  ;;  %v627_v34 = vld [vmem:[#allocation4 + $0x110] sm:$0xff] }
  0x6a   : > { %476 = vmatpush2.msra.mxu0 %v357_v38  ;;  %546 = vmatprep.subr.mxu1 %v360_v49  ;;  %v622_v35 = vld [vmem:[#allocation4 + $0xe8] sm:$0xff]  ;;  %v624_v36 = vld [vmem:[#allocation4 + $0xf8] sm:$0xff]  ;;  %v623_v38 = vld [vmem:[#allocation4 + $0xf0] sm:$0xff] }
  0x6b   : > { %477 = vmatprep.subr.mxu0 %v354_v40  ;;  %547 = vmatpush2.msra.mxu1 %v359_v51  ;;  %v618_v39 = vld [vmem:[#allocation4 + $0xc8] sm:$0xff]  ;;  %v620_v40 = vld [vmem:[#allocation4 + $0xd8] sm:$0xff]  ;;  %v617_v41 = vld [vmem:[#allocation4 + $0xc0] sm:$0xff] }
  0x6c   : > { %478 = vmatpush2.msra.mxu0 %v353_v42  ;;  %548 = vmatprep.subr.mxu1 %v356_v53  ;;  %v619_v42 = vld [vmem:[#allocation4 + $0xd0] sm:$0xff]  ;;  %v614_v43 = vld [vmem:[#allocation4 + $0xa8] sm:$0xff]  ;;  %v613_v45 = vld [vmem:[#allocation4 + $0xa0] sm:$0xff] }
  0x6d   : > { %479 = vmatprep.subr.mxu0 %v350_v44  ;;  %549 = vmatpush2.msra.mxu1 %v355_v55  ;;  %v616_v44 = vld [vmem:[#allocation4 + $0xb8] sm:$0xff]  ;;  %v610_v47 = vld [vmem:[#allocation4 + $0x88] sm:$0xff]  ;;  %v609_v49 = vld [vmem:[#allocation4 + $0x80] sm:$0xff] }
  0x6e   : > { %480 = vmatpush2.msra.mxu0 %v349_v46  ;;  %550 = vmatprep.subr.mxu1 %v352_v57  ;;  %v615_v46 = vld [vmem:[#allocation4 + $0xb0] sm:$0xff]  ;;  %v606_v51 = vld [vmem:[#allocation4 + $0x68] sm:$0xff]  ;;  %v605_v53 = vld [vmem:[#allocation4 + $0x60] sm:$0xff] }
  0x6f   : > { %481 = vmatprep.subr.mxu0 %v346_v48  ;;  %551 = vmatpush2.msra.mxu1 %v351_v59  ;;  %v612_v48 = vld [vmem:[#allocation4 + $0x98] sm:$0xff]  ;;  %v602_v55 = vld [vmem:[#allocation4 + $0x48] sm:$0xff]  ;;  %v601_v57 = vld [vmem:[#allocation4 + $0x40] sm:$0xff] }
  0x70   : > { %482 = vmatpush2.msra.mxu0 %v345_v50  ;;  %552 = vmatprep.subr.mxu1 %v348_v61  ;;  %v611_v50 = vld [vmem:[#allocation4 + $0x90] sm:$0xff]  ;;  %v598_v59 = vld [vmem:[#allocation4 + $0x28] sm:$0xff]  ;;  %v597_v61 = vld [vmem:[#allocation4 + $0x20] sm:$0xff] }
  0x71   : > { %483 = vmatprep.subr.mxu0 %v342_v52  ;;  %553 = vmatpush2.msra.mxu1 %v347_v62  ;;  %v608_v52 = vld [vmem:[#allocation4 + $0x78] sm:$0xff]  ;;  %v599_v62 = vld [vmem:[#allocation4 + $0x30] sm:$0xff] }
  0x72   : > { %484 = vmatpush2.msra.mxu0 %v341_v54  ;;  %558 = vmatprep.mubr.f32.mxu1 %v271_v37  ;;  %v621_v37 = vld [vmem:[#allocation4 + $0xe0] sm:$0xff]  ;;  %v607_v54 = vld [vmem:[#allocation4 + $0x70] sm:$0xff] }
  0x73   : > { %485 = vmatprep.subr.mxu0 %v338_v56  ;;  %554 = vmatprep.subr.mxu1 %v344_v63  ;;  %v604_v56 = vld [vmem:[#allocation4 + $0x58] sm:$0xff]  ;;  %v594_v63 = vld [vmem:[#allocation4 + $0x8] sm:$0xff] }
  0x74   : > { %486 = vmatpush2.msra.mxu0 %v337_v58  ;;  %555 = vmatpush2.msra.mxu1 %v343_v1  ;;  %v603_v58 = vld [vmem:[#allocation4 + $0x50] sm:$0xff]  ;;  %v593_v1 = vld [vmem:[#allocation4] sm:$0xff] }
  0x75   : > { %488 = vmatmul.mubr.f32.vlgmr.msra.gmra.mxu0 %v270_v60  ;;  %743 = vmatprep.subr.mxu0 %v654_v0  ;;  %v596_v0 = vld [vmem:[#allocation4 + $0x18] sm:$0xff] }
  0x76   : > { %744 = vmatpush1.msra.mxu0 %v653_v2  ;;  %556 = vmatprep.subr.mxu1 %v340_v3  ;;  %v595_v2 = vld [vmem:[#allocation4 + $0x10] sm:$0xff]  ;;  %v718_v3 = vld [vmem:[#allocation4 + $0x3e8] sm:$0xff] }
  0x77   : > { %745 = vmatprep.subr.mxu0 %v650_v4  ;;  %557 = vmatpush2.msra.mxu1 %v339_v5  ;;  %v720_v4 = vld [vmem:[#allocation4 + $0x3f8] sm:$0xff]  ;;  %v717_v5 = vld [vmem:[#allocation4 + $0x3e0] sm:$0xff] }
  0x78   : > { %746 = vmatpush1.msra.mxu0 %v649_v6  ;;  %559 = vmatmul.mubr.f32.vlgmr.msra.gmra.mxu1 %v270_v60  ;;  %v600_v60 = vld [vmem:[#allocation4 + $0x38] sm:$0xff]  ;;  %v719_v6 = vld [vmem:[#allocation4 + $0x3f0] sm:$0xff] }
  0x79   : > { %814 = vmatprep.subr.mxu1 %v656_v7  ;;  %747 = vmatprep.subr.mxu0 %v646_v9  ;;  %v714_v7 = vld [vmem:[#allocation4 + $0x3c8] sm:$0xff]  ;;  %v713_v9 = vld [vmem:[#allocation4 + $0x3c0] sm:$0xff] }
  0x7a   : > { %815 = vmatpush1.msra.mxu1 %v655_v8  ;;  %748 = vmatpush1.msra.mxu0 %v645_v11  ;;  %v716_v8 = vld [vmem:[#allocation4 + $0x3d8] sm:$0xff]  ;;  %v710_v11 = vld [vmem:[#allocation4 + $0x3a8] sm:$0xff] }
  0x7b   : > { %816 = vmatprep.subr.mxu1 %v652_v10  ;;  %749 = vmatprep.subr.mxu0 %v642_v13  ;;  %v715_v10 = vld [vmem:[#allocation4 + $0x3d0] sm:$0xff]  ;;  %v709_v13 = vld [vmem:[#allocation4 + $0x3a0] sm:$0xff] }
  0x7c   : > { %817 = vmatpush1.msra.mxu1 %v651_v12  ;;  %750 = vmatpush1.msra.mxu0 %v641_v17  ;;  %v712_v12 = vld [vmem:[#allocation4 + $0x3b8] sm:$0xff]  ;;  %v705_v17 = vld [vmem:[#allocation4 + $0x380] sm:$0xff] }
  0x7d   : > { %818 = vmatprep.subr.mxu1 %v648_v14  ;;  %751 = vmatprep.subr.mxu0 %v638_v19  ;;  %v711_v14 = vld [vmem:[#allocation4 + $0x3b0] sm:$0xff]  ;;  %v702_v19 = vld [vmem:[#allocation4 + $0x368] sm:$0xff] }
  0x7e   : > { %819 = vmatpush1.msra.mxu1 %v647_v15  ;;  %752 = vmatpush1.msra.mxu0 %v637_v21  ;;  %v706_v15 = vld [vmem:[#allocation4 + $0x388] sm:$0xff]  ;;  %v701_v21 = vld [vmem:[#allocation4 + $0x360] sm:$0xff] }
  0x7f   : > { %820 = vmatprep.subr.mxu1 %v644_v16  ;;  %753 = vmatprep.subr.mxu0 %v634_v23  ;;  %v708_v16 = vld [vmem:[#allocation4 + $0x398] sm:$0xff]  ;;  %v698_v23 = vld [vmem:[#allocation4 + $0x348] sm:$0xff] }
  0x80   : > { %821 = vmatpush1.msra.mxu1 %v643_v18  ;;  %754 = vmatpush1.msra.mxu0 %v633_v25  ;;  %v707_v18 = vld [vmem:[#allocation4 + $0x390] sm:$0xff]  ;;  %v697_v25 = vld [vmem:[#allocation4 + $0x340] sm:$0xff] }
  0x81   : > { %822 = vmatprep.subr.mxu1 %v640_v20  ;;  %755 = vmatprep.subr.mxu0 %v630_v27  ;;  %v704_v20 = vld [vmem:[#allocation4 + $0x378] sm:$0xff]  ;;  %v694_v27 = vld [vmem:[#allocation4 + $0x328] sm:$0xff] }
  0x82   : > { %823 = vmatpush1.msra.mxu1 %v639_v22  ;;  %756 = vmatpush1.msra.mxu0 %v629_v29  ;;  %v703_v22 = vld [vmem:[#allocation4 + $0x370] sm:$0xff]  ;;  %v693_v29 = vld [vmem:[#allocation4 + $0x320] sm:$0xff] }
  0x83   : > { %824 = vmatprep.subr.mxu1 %v636_v24  ;;  %757 = vmatprep.subr.mxu0 %v626_v31  ;;  %v700_v24 = vld [vmem:[#allocation4 + $0x358] sm:$0xff]  ;;  %v690_v31 = vld [vmem:[#allocation4 + $0x308] sm:$0xff] }
  0x84   : > { %825 = vmatpush1.msra.mxu1 %v635_v26  ;;  %758 = vmatpush1.msra.mxu0 %v625_v33  ;;  %v699_v26 = vld [vmem:[#allocation4 + $0x350] sm:$0xff]  ;;  %v689_v33 = vld [vmem:[#allocation4 + $0x300] sm:$0xff] }
  0x85   : > { %826 = vmatprep.subr.mxu1 %v632_v28  ;;  %759 = vmatprep.subr.mxu0 %v622_v35  ;;  %v696_v28 = vld [vmem:[#allocation4 + $0x338] sm:$0xff]  ;;  %v686_v35 = vld [vmem:[#allocation4 + $0x2e8] sm:$0xff] }
  0x86   : > { %827 = vmatpush1.msra.mxu1 %v631_v30  ;;  %760 = vmatpush1.msra.mxu0 %v621_v37  ;;  %v695_v30 = vld [vmem:[#allocation4 + $0x330] sm:$0xff]  ;;  %v685_v37 = vld [vmem:[#allocation4 + $0x2e0] sm:$0xff] }
  0x87   : > { %828 = vmatprep.subr.mxu1 %v628_v32  ;;  %761 = vmatprep.subr.mxu0 %v618_v39  ;;  %v692_v32 = vld [vmem:[#allocation4 + $0x318] sm:$0xff]  ;;  %v682_v39 = vld [vmem:[#allocation4 + $0x2c8] sm:$0xff] }
  0x88   : > { %829 = vmatpush1.msra.mxu1 %v627_v34  ;;  %762 = vmatpush1.msra.mxu0 %v617_v41  ;;  %v691_v34 = vld [vmem:[#allocation4 + $0x310] sm:$0xff]  ;;  %v681_v41 = vld [vmem:[#allocation4 + $0x2c0] sm:$0xff] }
  0x89   : > { %830 = vmatprep.subr.mxu1 %v624_v36  ;;  %763 = vmatprep.subr.mxu0 %v614_v43  ;;  %v688_v36 = vld [vmem:[#allocation4 + $0x2f8] sm:$0xff]  ;;  %v678_v43 = vld [vmem:[#allocation4 + $0x2a8] sm:$0xff] }
  0x8a   : > { %831 = vmatpush1.msra.mxu1 %v623_v38  ;;  %764 = vmatpush1.msra.mxu0 %v613_v45  ;;  %v687_v38 = vld [vmem:[#allocation4 + $0x2f0] sm:$0xff]  ;;  %v677_v45 = vld [vmem:[#allocation4 + $0x2a0] sm:$0xff] }
  0x8b   : > { %832 = vmatprep.subr.mxu1 %v620_v40  ;;  %765 = vmatprep.subr.mxu0 %v610_v47  ;;  %v684_v40 = vld [vmem:[#allocation4 + $0x2d8] sm:$0xff]  ;;  %v674_v47 = vld [vmem:[#allocation4 + $0x288] sm:$0xff] }
  0x8c   : > { %833 = vmatpush1.msra.mxu1 %v619_v42  ;;  %766 = vmatpush1.msra.mxu0 %v609_v49  ;;  %v683_v42 = vld [vmem:[#allocation4 + $0x2d0] sm:$0xff]  ;;  %v673_v49 = vld [vmem:[#allocation4 + $0x280] sm:$0xff] }
  0x8d   : > { %834 = vmatprep.subr.mxu1 %v616_v44  ;;  %767 = vmatprep.subr.mxu0 %v606_v51  ;;  %v680_v44 = vld [vmem:[#allocation4 + $0x2b8] sm:$0xff]  ;;  %v670_v51 = vld [vmem:[#allocation4 + $0x268] sm:$0xff] }
  0x8e   : > { %835 = vmatpush1.msra.mxu1 %v615_v46  ;;  %768 = vmatpush1.msra.mxu0 %v605_v53  ;;  %v679_v46 = vld [vmem:[#allocation4 + $0x2b0] sm:$0xff]  ;;  %v669_v53 = vld [vmem:[#allocation4 + $0x260] sm:$0xff] }
  0x8f   : > { %836 = vmatprep.subr.mxu1 %v612_v48  ;;  %769 = vmatprep.subr.mxu0 %v602_v55  ;;  %v676_v48 = vld [vmem:[#allocation4 + $0x298] sm:$0xff]  ;;  %v666_v55 = vld [vmem:[#allocation4 + $0x248] sm:$0xff] }
  0x90   : > { %837 = vmatpush1.msra.mxu1 %v611_v50  ;;  %770 = vmatpush1.msra.mxu0 %v601_v57  ;;  %v675_v50 = vld [vmem:[#allocation4 + $0x290] sm:$0xff]  ;;  %v665_v57 = vld [vmem:[#allocation4 + $0x240] sm:$0xff] }
  0x91   : > { %838 = vmatprep.subr.mxu1 %v608_v52  ;;  %771 = vmatprep.subr.mxu0 %v598_v59  ;;  %v672_v52 = vld [vmem:[#allocation4 + $0x278] sm:$0xff]  ;;  %v662_v59 = vld [vmem:[#allocation4 + $0x228] sm:$0xff] }
  0x92   : > { %839 = vmatpush1.msra.mxu1 %v607_v54  ;;  %772 = vmatpush1.msra.mxu0 %v597_v61  ;;  %v671_v54 = vld [vmem:[#allocation4 + $0x270] sm:$0xff]  ;;  %v661_v61 = vld [vmem:[#allocation4 + $0x220] sm:$0xff] }
  0x93   : > { %840 = vmatprep.subr.mxu1 %v604_v56  ;;  %773 = vmatprep.subr.mxu0 %v594_v63  ;;  %v668_v56 = vld [vmem:[#allocation4 + $0x258] sm:$0xff]  ;;  %v658_v63 = vld [vmem:[#allocation4 + $0x208] sm:$0xff] }
  0x94   : > { %841 = vmatpush1.msra.mxu1 %v603_v58  ;;  %774 = vmatpush1.msra.mxu0 %v593_v1  ;;  %v667_v58 = vld [vmem:[#allocation4 + $0x250] sm:$0xff]  ;;  %v657_v1 = vld [vmem:[#allocation4 + $0x200] sm:$0xff] }
  0x95   : > { %842 = vmatprep.subr.mxu1 %v600_v60  ;;  %775 = vmatprep.subr.mxu0 %v718_v3  ;;  %v664_v60 = vld [vmem:[#allocation4 + $0x238] sm:$0xff]  ;;  %v659_v3 = vld [vmem:[#allocation4 + $0x210] sm:$0xff] }
  0x96   : > { %843 = vmatpush1.msra.mxu1 %v599_v62  ;;  %776 = vmatpush2.msra.mxu0 %v717_v5  ;;  %v663_v62 = vld [vmem:[#allocation4 + $0x230] sm:$0xff] }
  0x97   : > { %844 = vmatprep.subr.mxu1 %v596_v0  ;;  %777 = vmatprep.subr.mxu0 %v714_v7  ;;  %v660_v0 = vld [vmem:[#allocation4 + $0x218] sm:$0xff]  ;;  %v401_v7 = vld [vmem:[%s1278_s2] sm:$0xf] }
  0x98   : > { %845 = vmatpush1.msra.mxu1 %v595_v2  ;;  %778 = vmatpush2.msra.mxu0 %v713_v9  ;;  %v982_v2 = vld [vmem:[%s1281_s5 + $0x8] sm:$0xff] }
  0x99   : > { %846 = vmatprep.subr.mxu1 %v720_v4  ;;  %779 = vmatprep.subr.mxu0 %v710_v11  ;;  %v403_v4 = vlaneseq }
  0x9a   : > { %847 = vmatpush2.msra.mxu1 %v719_v6  ;;  %780 = vmatpush2.msra.mxu0 %v709_v13 }
  0x9b   : > { %848 = vmatprep.subr.mxu1 %v716_v8  ;;  %781 = vmatprep.subr.mxu0 %v706_v15  ;;  %v1243_v5 = vshrl.u32 %v403_v4, 7 }
  0x9c   : > { %849 = vmatpush2.msra.mxu1 %v715_v10  ;;  %782 = vmatpush2.msra.mxu0 %v705_v17 }
  0x9d   : > { %850 = vmatprep.subr.mxu1 %v712_v12  ;;  %783 = vmatprep.subr.mxu0 %v702_v19  ;;  %v405_v6 = vsub.s32 0, %v1243_v5  ;;  %v409_v8 = vsub.s32 1, %v1243_v5  ;;  %v413_v19 = vsub.s32 2, %v1243_v5 }
  0x9e   : > { %851 = vmatpush2.msra.mxu1 %v711_v14  ;;  %784 = vmatpush2.msra.mxu0 %v701_v21 }
  0x9f   : > { %852 = vmatprep.subr.mxu1 %v708_v16  ;;  %785 = vmatprep.subr.mxu0 %v698_v23  ;;  %v406_v9 = vrot.slane %v401_v7, %v405_v6  ;;  %v410_v10 = vrot.slane %v401_v7, %v409_v8  ;;  %v417_v16 = vsub.s32 3, %v1243_v5 }
  0xa0   : > { %853 = vmatpush2.msra.mxu1 %v707_v18  ;;  %786 = vmatpush2.msra.mxu0 %v697_v25 }
  0xa1   : > { %854 = vmatprep.subr.mxu1 %v704_v20  ;;  %787 = vmatprep.subr.mxu0 %v694_v27  ;;  %v418_v20 = vrot.slane %v401_v7, %v417_v16 }
  0xa2   : > { %855 = vmatpush2.msra.mxu1 %v703_v22  ;;  %788 = vmatpush2.msra.mxu0 %v693_v29  ;;  %v414_v22 = vrot.slane %v401_v7, %v413_v19 }
  0xa3   : > { %856 = vmatprep.subr.mxu1 %v700_v24  ;;  %789 = vmatprep.subr.mxu0 %v690_v31 }
  0xa4   : > { %857 = vmatpush2.msra.mxu1 %v699_v26  ;;  %790 = vmatpush2.msra.mxu0 %v689_v33  ;;  %v272_v33 = vld [vmem:[%s1282_s6] sm:$0xff] }
  0xa5   : > { %858 = vmatprep.subr.mxu1 %v696_v28  ;;  %791 = vmatprep.subr.mxu0 %v686_v35 }
  0xa6   : > { %859 = vmatpush2.msra.mxu1 %v695_v30  ;;  %792 = vmatpush2.msra.mxu0 %v685_v37 }
  0xa7   : > { %860 = vmatprep.subr.mxu1 %v692_v32  ;;  %793 = vmatprep.subr.mxu0 %v682_v39 }
  0xa8   : > { %861 = vmatpush2.msra.mxu1 %v691_v34  ;;  %794 = vmatpush2.msra.mxu0 %v681_v41 }
  0xa9   : > { %862 = vmatprep.subr.mxu1 %v688_v36  ;;  %795 = vmatprep.subr.mxu0 %v678_v43 }
  0xaa   : > { %863 = vmatpush2.msra.mxu1 %v687_v38  ;;  %796 = vmatpush2.msra.mxu0 %v677_v45 }
  0xab   : > { %864 = vmatprep.subr.mxu1 %v684_v40  ;;  %797 = vmatprep.subr.mxu0 %v674_v47 }
  0xac   : > { %865 = vmatpush2.msra.mxu1 %v683_v42  ;;  %798 = vmatpush2.msra.mxu0 %v673_v49  ;;  %v721_v42 = vld [vmem:[%s1280_s4] sm:$0xf] }
  0xad   : > { %866 = vmatprep.subr.mxu1 %v680_v44  ;;  %799 = vmatprep.subr.mxu0 %v670_v51  ;;  %v726_v43 = vrot.slane %v721_v42, %v405_v6  ;;  %v730_v44 = vrot.slane %v721_v42, %v409_v8 }
  0xae   : > { %867 = vmatpush2.msra.mxu1 %v679_v46  ;;  %800 = vmatpush2.msra.mxu0 %v669_v53 }
  0xaf   : > { %868 = vmatprep.subr.mxu1 %v676_v48  ;;  %801 = vmatprep.subr.mxu0 %v666_v55  ;;  %v734_v55 = vrot.slane %v721_v42, %v413_v19 }
  0xb0   : > { %869 = vmatpush2.msra.mxu1 %v675_v50  ;;  %802 = vmatpush2.msra.mxu0 %v665_v57 }
  0xb1   : > { %870 = vmatprep.subr.mxu1 %v672_v52  ;;  %803 = vmatprep.subr.mxu0 %v662_v59  ;;  %v738_v52 = vrot.slane %v721_v42, %v417_v16 }
  0xb2   : > { %871 = vmatpush2.msra.mxu1 %v671_v54  ;;  %804 = vmatpush2.msra.mxu0 %v661_v61 }
  0xb3   : > { %872 = vmatprep.subr.mxu1 %v668_v56  ;;  %805 = vmatprep.subr.mxu0 %v658_v63 }
  0xb4   : > { %873 = vmatpush2.msra.mxu1 %v667_v58  ;;  %806 = vmatpush2.msra.mxu0 %v657_v1 }
  0xb5   : > { %874 = vmatprep.subr.mxu1 %v664_v60  ;;  %807 = vmatprep.mubr.f32.mxu0 %v982_v2 }
  0xb6   : > { %875 = vmatpush2.msra.mxu1 %v663_v62  ;;  %878 = vmatprep.mubr.f32.mxu1 %v982_v2 }
  0xb7   : > { %876 = vmatprep.subr.mxu1 %v660_v0  ;;  %v983_v0 = vld [vmem:[%s1282_s6 + $0x8] sm:$0xff] }
  0xb8   : > { %877 = vmatpush2.msra.mxu1 %v659_v3 }
 0x135   : > { %v489_v11 = vpop.f32.mrf.mxu0 }
 0x136   : > { %v490_v12 = vadd.f32 %v489_v11, %v406_v9 }
 0x137   : > { %v491_v13 = vpop.f32.mrf.mxu0 }
 0x138   : > { %v979_v14 = vmul.f32 -1.442695, %v490_v12  ;;  %v492_v15 = vadd.f32 %v491_v13, %v410_v10  ;;  %v560_v18 = vpop.f32.mrf.mxu1 }
 0x139   : > { %v561_v24 = vadd.f32 %v560_v18, %v414_v22 }
 0x13a   : > { %1023 = vpow2.f32 %v979_v14  ;;  %v980_v17 = vmul.f32 -1.442695, %v492_v15  ;;  %v562_v21 = vpop.f32.mrf.mxu1 }
 0x13b   : > { %v563_v23 = vadd.f32 %v562_v21, %v418_v20 }
 0x13c   : > { %1025 = vpow2.f32 %v980_v17 }
 0x13d   : > { %v981_v25 = vmul.f32 -1.442695, %v563_v23  ;;  %1027 = vtanh.f32 %v561_v24 }
 0x13f   : > { %1029 = vpow2.f32 %v981_v25 }
 0x147   : > { %v1024_v26 = vpop.eup %1023 }
 0x148   : > { %v574_v27 = vadd.f32 1.0, %v1024_v26 }
 0x149   : > { %v1026_v28 = vpop.eup %1025 }
 0x14a   : > { %1031 = vrcp.f32 %v574_v27  ;;  %v575_v29 = vadd.f32 1.0, %v1026_v28  ;;  %v1028_v30 = vpop.eup %1027 }
 0x14c   : > { %1033 = vrcp.f32 %v575_v29  ;;  %v1030_v31 = vpop.eup %1029 }
 0x14d   : > { %v576_v35 = vadd.f32 1.0, %v1030_v31 }
 0x14f   : > { %1035 = vrcp.f32 %v576_v35 }
 0x157   : > { %v1032_v32 = vpop.eup %1031 }
 0x158   : > { %v585_v37 = vmul.f32 %v1032_v32, %v1028_v30 }
 0x159   : > { %v1034_v34 = vpop.eup %1033 }
 0x15a   : > { %v584_v36 = vmul.f32 %v1034_v34, %v272_v33 }
 0x15c   : > { %v586_v38 = vadd.f32 %v585_v37, %v584_v36  ;;  %v1036_v39 = vpop.eup %1035 }
 0x15e   : > { %1037 = vtanh.f32 %v586_v38  ;;  %910 = vst [vmem:[%s1282_s6] sm:$0xff] %v586_v38 }
 0x16b   : > { %v1038_v40 = vpop.eup %1037 }
 0x16c   : > { %v588_v41 = vmul.f32 %v1038_v40, %v1036_v39 }
 0x16e   : > { %808 = vmatmul.mubr.f32.vlgmr.msra.gmra.mxu0 %v588_v41  ;;  %909 = vst [vmem:[%s1281_s5] sm:$0xff] %v588_v41  ;;  %879 = vmatmul.mubr.f32.vlgmr.msra.gmra.mxu1 %v588_v41 }
 0x22e   : > { %v809_v45 = vpop.f32.mrf.mxu0  ;;  %v880_v50 = vpop.f32.mrf.mxu1 }
 0x22f   : > { %v810_v46 = vadd.f32 %v809_v45, %v726_v43  ;;  %v881_v58 = vadd.f32 %v880_v50, %v734_v55 }
 0x230   : > { %v811_v47 = vpop.f32.mrf.mxu0  ;;  %v882_v53 = vpop.f32.mrf.mxu1 }
 0x231   : > { %v984_v48 = vmul.f32 -1.442695, %v810_v46  ;;  %v812_v49 = vadd.f32 %v811_v47, %v730_v44  ;;  %v883_v54 = vadd.f32 %v882_v53, %v738_v52 }
 0x233   : > { %1039 = vpow2.f32 %v984_v48  ;;  %v985_v51 = vmul.f32 -1.442695, %v812_v49  ;;  %v986_v56 = vmul.f32 -1.442695, %v883_v54 }
 0x235   : > { %1041 = vpow2.f32 %v985_v51 }
 0x236   : > { %1043 = vpow2.f32 %v986_v56 }
 0x240   : > { %v1040_v57 = vpop.eup %1039 }
 0x241   : > { %v894_v59 = vadd.f32 1.0, %v1040_v57 }
 0x242   : > { %v1042_v60 = vpop.eup %1041 }
 0x243   : > { %1045 = vrcp.f32 %v894_v59  ;;  %v895_v61 = vadd.f32 1.0, %v1042_v60  ;;  %v1044_v62 = vpop.eup %1043 }
 0x244   : > { %1047 = vtanh.f32 %v881_v58  ;;  %v896_v3 = vadd.f32 1.0, %v1044_v62 }
 0x245   : > { %1049 = vrcp.f32 %v895_v61 }
 0x246   : > { %1051 = vrcp.f32 %v896_v3 }
 0x250   : > { %v1046_v63 = vpop.eup %1045 }
 0x251   : > { %v1048_v1 = vpop.eup %1047 }
 0x252   : > { %v1050_v2 = vpop.eup %1049  ;;  %v905_v4 = vmul.f32 %v1048_v1, %v1046_v63 }
 0x253   : > { %v904_v5 = vmul.f32 %v1050_v2, %v983_v0  ;;  %v1052_v7 = vpop.eup %1051 }
 0x255   : > { %v906_v6 = vadd.f32 %v905_v4, %v904_v5 }
 0x257   : > { %1053 = vtanh.f32 %v906_v6  ;;  %988 = vst [vmem:[%s1282_s6 + $0x8] sm:$0xff] %v906_v6 }
 0x264   : > { %v1054_v8 = vpop.eup %1053 }
 0x265   : > { %v908_v9 = vmul.f32 %v1054_v8, %v1052_v7 }
 0x267   : > { %987 = vst [vmem:[%s1281_s5 + $0x8] sm:$0xff] %v908_v9 }
 0x268 PF: > { %s19_s21 = sadd.s32 1, %s1121_s21  }
 0x269   : > { %p16_p4 = scmp.ge.s32.totalorder %s19_s21, 12  }
 0x26b   :  { %18 = sbr.rel (!%p16_p4) target bundleno = 2 (0x2), region = 89 }
 0x270   :  { %930 = vsyncpa [#allocation3], 1 }
 0x271   :  { %932 = vsyncpa [#allocation3 + $0x1], 1 }
 0x272   :  { %933 = vsyncpa [#allocation5], 1 }

// kernel: encoder_decoder_forward.3
= control target key start
LH: loop header
LB: loop body
LE: loop exit
PB: predicated region body
PF: predicated region fallthrough
CT: control target
= control target key end

     0   :  { %s2548_s0 = inlined_call_operand.vmem [shape: s32[8], index: 0, kind: input, shape index: {}]   ;;  %s2549_s1 = inlined_call_operand.vmem [shape: f32[8,8,128], index: 1, kind: input, shape index: {}, may-alias: {1,2}]   ;;  %s2550_s2 = inlined_call_operand.vmem [shape: f32[8,8,128], index: 2, kind: input, shape index: {}, may-alias: {1,2}]   ;;  %s2551_s3 = inlined_call_operand.vmem [shape: f32[2,8,128], index: 3, kind: input, shape index: {}]   ;;  %s2552_s4 = inlined_call_operand.vmem [shape: f32[2,8,128], index: 4, kind: input, shape index: {}]   ;;  %s2553_s5 = inlined_call_operand.vmem [shape: f32[128,128], index: 5, kind: input, shape index: {}]   ;;  %s2554_s6 = inlined_call_operand.vmem [shape: f32[256,512], index: 6, kind: input, shape index: {}]   ;;  %s2555_s7 = inlined_call_operand.vmem [shape: f32[1,512], index: 7, kind: input, shape index: {}]   ;;  %s2556_s8 = inlined_call_operand.vmem [shape: f32[256,512], index: 8, kind: input, shape index: {}]   ;;  %s2557_s9 = inlined_call_operand.vmem [shape: f32[1,512], index: 9, kind: input, shape index: {}]   ;;  %s2558_s10 = inlined_call_operand.vmem [shape: f32[128,128], index: 10, kind: input, shape index: {}]   ;;  %s2559_s11 = inlined_call_operand.vmem [shape: f32[1,128], index: 11, kind: input, shape index: {}]   ;;  %s2560_s12 = inlined_call_operand.vmem [shape: f32[7,8,128], index: 12, kind: output, shape index: {}]  }
   0x1   :  { %s17_s23 = sshll.u32 %s2548_s0, 4  ;;  %s18_s23 = int_to_ptr.vmem [resolvable:$true] %s17_s23 }
   0x2   :  { %s1478_s24 = scalar_lea.vmem %s18_s23, 16  ;;  %p1483_p1 = scmp.lt.s32.totalorder %s18_s23, %s18_s23 }
   0x3   :  { %p1479_p0 = scmp.ne.s32.totalorder %s18_s23, %s1478_s24  ;;  %p1484_p2 = scmp.lt.s32.totalorder %s1478_s24, %s1478_s24 }
   0x5   :  { %p1485_p3 = por %p1484_p2, %p1483_p1 }
   0x7   :  { %p1486_p4 = pnand %p1485_p3, %p1479_p0 }
   0x9   :  { %1489 = shalt.err (!%p1486_p4)  }
   0xa   :  { %s1500_s25 = smov [#allocation6]  }
   0xb   :  { %20 = dma.vmem_to_smem %s18_s23, 16, %s1500_s25, [#allocation5] }
   0xc   :  { %1494 = dma.done.wait [#allocation5], 16 }
   0xd   :  { %1495 = vsyncadd [#allocation5], 4294967280 }
   0xe   :  { %22 = sfence }
   0xf   :  { %s1571_s26 = smov 0  }
  0x10 LB: > { %s1313_s0 = sadd.s32 4294967295, %s1498_s26   ;;  %p1317_p5 = scmp.ge.s32.totalorder %s1498_s26, 1  ;;  %s1498_s26 = sphi %s1571_s26, %s28_s26  }
  0x11   : > { %p347_p6 = scmp.lt.s32.totalorder %s1498_s26, 8 }
  0x13   : > { %p348_p7 = pnand %p1317_p5, %p347_p6 }
  0x14   : > { %s1579_s27 = sadd.s32 (!%p348_p7), 1, %s1313_s0  ;;  %p392_p8 = scmp.lt.s32.totalorder (!%p348_p7), %s1313_s0, 6 }
  0x15   : > { %351 = sbr.rel (%p348_p7) target bundleno = 1242 (0x4da), region = 64  ;;  %p387_p9 = scmp.lt.s32.totalorder (!%p348_p7), %s1579_s27, 7 }
  0x16   : > { %p1320_p10 = scmp.ne.s32.totalorder (!%p348_p7), %s1313_s0, 0 }
  0x1a   : > { %s393_s28 = scalar_select %p392_p8, %s1313_s0, 6 }
  0x1b   : > { %s388_s29 = scalar_select %p387_p9, %s1579_s27, 7 }
  0x1c   : > { %s1319_s30 = sshll.u32 %s393_s28, 3  ;;  %400 = sbr.rel (%p1320_p10) target bundleno = 37 (0x25), region = 68 }
  0x1d   : > { %s1318_s13 = sshll.u32 %s388_s29, 3  ;;  %s1586_s16 = scalar_lea.vmem %s2560_s12, %s1319_s30 }
  0x1e   : > { %s1591_s19 = scalar_lea.vmem %s2550_s2, %s1318_s13 }
  0x21   : > { %v401_v0 = vld [vmem:[%s2551_s3] sm:$0xff]  ;;  %v402_v1 = vld [vmem:[%s2551_s3 + $0x8] sm:$0xff] }
  0x22   : > { %v405_v2 = vld [vmem:[%s2552_s4] sm:$0xff]  ;;  %403 = vst [vmem:[#allocation2] sm:$0xff] %v401_v0  ;;  %404 = vst [vmem:[#allocation2 + $0x8] sm:$0xff] %v402_v1  ;;  %v406_v3 = vld [vmem:[%s2552_s4 + $0x8] sm:$0xff] }
  0x23   : > { %407 = vst [vmem:[#allocation3 + $0x8] sm:$0xff] %v405_v2  ;;  %v409_v4 = vld [vmem:[%s2549_s1] sm:$0xff]  ;;  %408 = vst [vmem:[#allocation3] sm:$0xff] %v406_v3 }
  0x24   : > { %410 = vst [vmem:[#allocation4] sm:$0xff] %v409_v4 }
  0x25 PF: > { %v427_v5 = vld [vmem:[%s2553_s5 + $0x78] sm:$0xff]  ;;  %v1501_v6 = vmov 0.0   ;;  %v426_v7 = vld [vmem:[%s2553_s5 + $0x70] sm:$0xff]  ;;  %vm1502_vm0 = vmmov 0   ;;  %v425_v8 = vld [vmem:[%s2553_s5 + $0x68] sm:$0xff]  ;;  %s1248_s29 = sld [smem:[#allocation6 + %s1579_s27]] }
  0x26   : > { %1365 = vmatprep.subr.mxu0 %v1501_v6  ;;  %1397 = vmatprep.mubr.msk.f32.mxu0 %vm1502_vm0, %v1501_v6  ;;  %v424_v9 = vld [vmem:[%s2553_s5 + $0x60] sm:$0xff]  ;;  %v561_v10 = vld [vmem:[%s2554_s6 + $0x1e8] sm:$0xff]  ;;  %v423_v12 = vld [vmem:[%s2553_s5 + $0x58] sm:$0xff] }
  0x27   : > { %1366 = vmatpush3.msra.mxu0 %v427_v5  ;;  %650 = vmatprep.subr.mxu1 %v561_v10  ;;  %v560_v11 = vld [vmem:[%s2554_s6 + $0x1e0] sm:$0xff]  ;;  %v557_v13 = vld [vmem:[%s2554_s6 + $0x1c8] sm:$0xff]  ;;  %v422_v16 = vld [vmem:[%s2553_s5 + $0x50] sm:$0xff] }
  0x28   : > { %1367 = vmatprep.subr.mxu0 %v1501_v6  ;;  %651 = vmatpush1.msra.mxu1 %v560_v11  ;;  %v556_v14 = vld [vmem:[%s2554_s6 + $0x1c0] sm:$0xff]  ;;  %v553_v15 = vld [vmem:[%s2554_s6 + $0x1a8] sm:$0xff]  ;;  %v419_v26 = vld [vmem:[%s2553_s5 + $0x38] sm:$0xff] }
  0x29   : > { %1368 = vmatpush3.msra.mxu0 %v426_v7  ;;  %652 = vmatprep.subr.mxu1 %v557_v13  ;;  %v552_v17 = vld [vmem:[%s2554_s6 + $0x1a0] sm:$0xff]  ;;  %v549_v18 = vld [vmem:[%s2554_s6 + $0x188] sm:$0xff]  ;;  %v418_v29 = vld [vmem:[%s2553_s5 + $0x30] sm:$0xff] }
  0x2a   : > { %1369 = vmatprep.subr.mxu0 %v1501_v6  ;;  %653 = vmatpush1.msra.mxu1 %v556_v14  ;;  %v548_v19 = vld [vmem:[%s2554_s6 + $0x180] sm:$0xff]  ;;  %v421_v20 = vld [vmem:[%s2553_s5 + $0x48] sm:$0xff]  ;;  %v415_v38 = vld [vmem:[%s2553_s5 + $0x18] sm:$0xff] }
  0x2b   : > { %1370 = vmatpush3.msra.mxu0 %v425_v8  ;;  %654 = vmatprep.subr.mxu1 %v553_v15  ;;  %v545_v21 = vld [vmem:[%s2554_s6 + $0x168] sm:$0xff]  ;;  %v544_v22 = vld [vmem:[%s2554_s6 + $0x160] sm:$0xff]  ;;  %v414_v41 = vld [vmem:[%s2553_s5 + $0x10] sm:$0xff]  ;;  %p1249_p11 = scmp.gt.s32.totalorder %s1248_s29, 0 }
  0x2c   : > { %1371 = vmatprep.subr.mxu0 %v1501_v6  ;;  %655 = vmatpush1.msra.mxu1 %v552_v17  ;;  %v420_v23 = vld [vmem:[%s2553_s5 + $0x40] sm:$0xff]  ;;  %v541_v24 = vld [vmem:[%s2554_s6 + $0x148] sm:$0xff]  ;;  %v563_v50 = vld [vmem:[%s2554_s6 + $0x1f8] sm:$0xff] }
  0x2d   : > { %1372 = vmatpush3.msra.mxu0 %v424_v9  ;;  %656 = vmatprep.subr.mxu1 %v549_v18  ;;  %v540_v25 = vld [vmem:[%s2554_s6 + $0x140] sm:$0xff]  ;;  %v537_v27 = vld [vmem:[%s2554_s6 + $0x128] sm:$0xff]  ;;  %v562_v51 = vld [vmem:[%s2554_s6 + $0x1f0] sm:$0xff]  ;;  %s1250_s0 = scalar_select %p1249_p11, 1, 0 }
  0x2e   : > { %1373 = vmatprep.subr.mxu0 %v1501_v6  ;;  %657 = vmatpush1.msra.mxu1 %v548_v19  ;;  %v536_v28 = vld [vmem:[%s2554_s6 + $0x120] sm:$0xff]  ;;  %v533_v30 = vld [vmem:[%s2554_s6 + $0x108] sm:$0xff]  ;;  %v559_v53 = vld [vmem:[%s2554_s6 + $0x1d8] sm:$0xff] }
  0x2f   : > { %1374 = vmatpush3.msra.mxu0 %v423_v12  ;;  %658 = vmatprep.subr.mxu1 %v545_v21  ;;  %v532_v31 = vld [vmem:[%s2554_s6 + $0x100] sm:$0xff]  ;;  %v417_v32 = vld [vmem:[%s2553_s5 + $0x28] sm:$0xff]  ;;  %v558_v55 = vld [vmem:[%s2554_s6 + $0x1d0] sm:$0xff]  ;;  %s1251_s30 = scvt.s32.f32 %s1250_s0 }
  0x30   : > { %1375 = vmatprep.subr.mxu0 %v1501_v6  ;;  %659 = vmatpush1.msra.mxu1 %v544_v22  ;;  %v529_v33 = vld [vmem:[%s2554_s6 + $0xe8] sm:$0xff]  ;;  %v528_v34 = vld [vmem:[%s2554_s6 + $0xe0] sm:$0xff]  ;;  %v555_v57 = vld [vmem:[%s2554_s6 + $0x1b8] sm:$0xff] }
  0x31   : > { %1376 = vmatpush3.msra.mxu0 %v422_v16  ;;  %660 = vmatprep.subr.mxu1 %v541_v24  ;;  %v416_v35 = vld [vmem:[%s2553_s5 + $0x20] sm:$0xff]  ;;  %v525_v36 = vld [vmem:[%s2554_s6 + $0xc8] sm:$0xff]  ;;  %v554_v59 = vld [vmem:[%s2554_s6 + $0x1b0] sm:$0xff]  ;;  %s1255_s13 = ssub.f32 1.0, %s1251_s30 }
  0x32   : > { %1377 = vmatprep.subr.mxu0 %v1501_v6  ;;  %661 = vmatpush1.msra.mxu1 %v540_v25  ;;  %v524_v37 = vld [vmem:[%s2554_s6 + $0xc0] sm:$0xff]  ;;  %v521_v39 = vld [vmem:[%s2554_s6 + $0xa8] sm:$0xff]  ;;  %v551_v61 = vld [vmem:[%s2554_s6 + $0x198] sm:$0xff] }
  0x33   : > { %1378 = vmatpush3.msra.mxu0 %v421_v20  ;;  %662 = vmatprep.subr.mxu1 %v537_v27  ;;  %v520_v40 = vld [vmem:[%s2554_s6 + $0xa0] sm:$0xff]  ;;  %v517_v42 = vld [vmem:[%s2554_s6 + $0x88] sm:$0xff]  ;;  %v550_v63 = vld [vmem:[%s2554_s6 + $0x190] sm:$0xff] }
  0x34   : > { %1379 = vmatprep.subr.mxu0 %v1501_v6  ;;  %663 = vmatpush1.msra.mxu1 %v536_v28  ;;  %v516_v43 = vld [vmem:[%s2554_s6 + $0x80] sm:$0xff]  ;;  %v413_v44 = vld [vmem:[%s2553_s5 + $0x8] sm:$0xff]  ;;  %v547_v1 = vld [vmem:[%s2554_s6 + $0x178] sm:$0xff] }
  0x35   : > { %1380 = vmatpush3.msra.mxu0 %v420_v23  ;;  %664 = vmatprep.subr.mxu1 %v533_v30  ;;  %v513_v45 = vld [vmem:[%s2554_s6 + $0x68] sm:$0xff]  ;;  %v512_v46 = vld [vmem:[%s2554_s6 + $0x60] sm:$0xff]  ;;  %v546_v3 = vld [vmem:[%s2554_s6 + $0x170] sm:$0xff] }
  0x36   : > { %1381 = vmatprep.subr.mxu0 %v1501_v6  ;;  %665 = vmatpush1.msra.mxu1 %v532_v31  ;;  %v412_v47 = vld [vmem:[%s2553_s5] sm:$0xff]  ;;  %v509_v48 = vld [vmem:[%s2554_s6 + $0x48] sm:$0xff]  ;;  %v543_v5 = vld [vmem:[%s2554_s6 + $0x158] sm:$0xff] }
  0x37   : > { %1382 = vmatpush3.msra.mxu0 %v419_v26  ;;  %666 = vmatprep.subr.mxu1 %v529_v33  ;;  %v411_v49 = vld [vmem:[#allocation4] sm:$0xff]  ;;  %v505_v54 = vld [vmem:[%s2554_s6 + $0x28] sm:$0xff]  ;;  %v542_v8 = vld [vmem:[%s2554_s6 + $0x150] sm:$0xff] }
  0x38   : > { %1383 = vmatprep.subr.mxu0 %v1501_v6  ;;  %667 = vmatpush1.msra.mxu1 %v528_v34  ;;  %v508_v52 = vld [vmem:[%s2554_s6 + $0x40] sm:$0xff]  ;;  %v501_v58 = vld [vmem:[%s2554_s6 + $0x8] sm:$0xff]  ;;  %v539_v10 = vld [vmem:[%s2554_s6 + $0x138] sm:$0xff] }
  0x39   : > { %1384 = vmatpush3.msra.mxu0 %v418_v29  ;;  %668 = vmatprep.subr.mxu1 %v525_v36  ;;  %v504_v56 = vld [vmem:[%s2554_s6 + $0x20] sm:$0xff]  ;;  %v625_v62 = vld [vmem:[%s2554_s6 + $0x3e8] sm:$0xff]  ;;  %v538_v12 = vld [vmem:[%s2554_s6 + $0x130] sm:$0xff] }
  0x3a   : > { %1385 = vmatprep.subr.mxu0 %v1501_v6  ;;  %669 = vmatpush1.msra.mxu1 %v524_v37  ;;  %v500_v60 = vld [vmem:[%s2554_s6] sm:$0xff]  ;;  %v621_v2 = vld [vmem:[%s2554_s6 + $0x3c8] sm:$0xff]  ;;  %v535_v14 = vld [vmem:[%s2554_s6 + $0x118] sm:$0xff] }
  0x3b   : > { %1386 = vmatpush3.msra.mxu0 %v417_v32  ;;  %670 = vmatprep.subr.mxu1 %v521_v39  ;;  %v624_v0 = vld [vmem:[%s2554_s6 + $0x3e0] sm:$0xff]  ;;  %v617_v7 = vld [vmem:[%s2554_s6 + $0x3a8] sm:$0xff]  ;;  %v534_v16 = vld [vmem:[%s2554_s6 + $0x110] sm:$0xff] }
  0x3c   : > { %1387 = vmatprep.subr.mxu0 %v1501_v6  ;;  %671 = vmatpush1.msra.mxu1 %v520_v40  ;;  %v620_v4 = vld [vmem:[%s2554_s6 + $0x3c0] sm:$0xff]  ;;  %v613_v11 = vld [vmem:[%s2554_s6 + $0x388] sm:$0xff]  ;;  %v531_v18 = vld [vmem:[%s2554_s6 + $0xf8] sm:$0xff] }
  0x3d   : > { %1388 = vmatpush3.msra.mxu0 %v416_v35  ;;  %672 = vmatprep.subr.mxu1 %v517_v42  ;;  %v616_v9 = vld [vmem:[%s2554_s6 + $0x3a0] sm:$0xff]  ;;  %v609_v15 = vld [vmem:[%s2554_s6 + $0x368] sm:$0xff]  ;;  %v530_v20 = vld [vmem:[%s2554_s6 + $0xf0] sm:$0xff] }
  0x3e   : > { %1389 = vmatprep.subr.mxu0 %v1501_v6  ;;  %673 = vmatpush1.msra.mxu1 %v516_v43  ;;  %v612_v13 = vld [vmem:[%s2554_s6 + $0x380] sm:$0xff]  ;;  %v605_v19 = vld [vmem:[%s2554_s6 + $0x348] sm:$0xff]  ;;  %v527_v22 = vld [vmem:[%s2554_s6 + $0xd8] sm:$0xff] }
  0x3f   : > { %1390 = vmatpush3.msra.mxu0 %v415_v38  ;;  %674 = vmatprep.subr.mxu1 %v513_v45  ;;  %v608_v17 = vld [vmem:[%s2554_s6 + $0x360] sm:$0xff]  ;;  %v601_v23 = vld [vmem:[%s2554_s6 + $0x328] sm:$0xff]  ;;  %v526_v24 = vld [vmem:[%s2554_s6 + $0xd0] sm:$0xff] }
  0x40   : > { %1391 = vmatprep.subr.mxu0 %v1501_v6  ;;  %675 = vmatpush1.msra.mxu1 %v512_v46  ;;  %v604_v21 = vld [vmem:[%s2554_s6 + $0x340] sm:$0xff]  ;;  %v523_v26 = vld [vmem:[%s2554_s6 + $0xb8] sm:$0xff]  ;;  %v597_v27 = vld [vmem:[%s2554_s6 + $0x308] sm:$0xff] }
  0x41   : > { %1392 = vmatpush3.msra.mxu0 %v414_v41  ;;  %676 = vmatprep.subr.mxu1 %v509_v48  ;;  %v600_v25 = vld [vmem:[%s2554_s6 + $0x320] sm:$0xff]  ;;  %v522_v28 = vld [vmem:[%s2554_s6 + $0xb0] sm:$0xff]  ;;  %v519_v30 = vld [vmem:[%s2554_s6 + $0x98] sm:$0xff] }
  0x42   : > { %1393 = vmatprep.subr.mxu0 %v1501_v6  ;;  %677 = vmatpush1.msra.mxu1 %v508_v52  ;;  %v596_v29 = vld [vmem:[%s2554_s6 + $0x300] sm:$0xff]  ;;  %v593_v31 = vld [vmem:[%s2554_s6 + $0x2e8] sm:$0xff]  ;;  %v518_v32 = vld [vmem:[%s2554_s6 + $0x90] sm:$0xff] }
  0x43   : > { %1394 = vmatpush3.msra.mxu0 %v413_v44  ;;  %678 = vmatprep.subr.mxu1 %v505_v54  ;;  %v592_v33 = vld [vmem:[%s2554_s6 + $0x2e0] sm:$0xff]  ;;  %v515_v34 = vld [vmem:[%s2554_s6 + $0x78] sm:$0xff]  ;;  %v589_v35 = vld [vmem:[%s2554_s6 + $0x2c8] sm:$0xff] }
  0x44   : > { %1395 = vmatprep.subr.mxu0 %v1501_v6  ;;  %679 = vmatpush1.msra.mxu1 %v504_v56  ;;  %v514_v36 = vld [vmem:[%s2554_s6 + $0x70] sm:$0xff]  ;;  %v588_v37 = vld [vmem:[%s2554_s6 + $0x2c0] sm:$0xff]  ;;  %v511_v38 = vld [vmem:[%s2554_s6 + $0x58] sm:$0xff] }
  0x45   : > { %1396 = vmatpush3.msra.mxu0 %v412_v47  ;;  %680 = vmatprep.subr.mxu1 %v501_v58  ;;  %v585_v39 = vld [vmem:[%s2554_s6 + $0x2a8] sm:$0xff]  ;;  %v510_v40 = vld [vmem:[%s2554_s6 + $0x50] sm:$0xff]  ;;  %v584_v41 = vld [vmem:[%s2554_s6 + $0x2a0] sm:$0xff] }
  0x46   : > { %1398 = vmatmul.mubr.f32.vlgmr.msra.gmra.mxu0 %v411_v49  ;;  %721 = vmatprep.subr.mxu0 %v563_v50  ;;  %v507_v42 = vld [vmem:[%s2554_s6 + $0x38] sm:$0xff]  ;;  %v581_v43 = vld [vmem:[%s2554_s6 + $0x288] sm:$0xff]  ;;  %v506_v44 = vld [vmem:[%s2554_s6 + $0x30] sm:$0xff] }
  0x47   : > { %722 = vmatpush1.msra.mxu0 %v562_v51  ;;  %681 = vmatpush1.msra.mxu1 %v500_v60  ;;  %v580_v45 = vld [vmem:[%s2554_s6 + $0x280] sm:$0xff]  ;;  %v503_v46 = vld [vmem:[%s2554_s6 + $0x18] sm:$0xff]  ;;  %v577_v47 = vld [vmem:[%s2554_s6 + $0x268] sm:$0xff] }
  0x48   : > { %723 = vmatprep.subr.mxu0 %v559_v53  ;;  %682 = vmatprep.subr.mxu1 %v625_v62  ;;  %v502_v48 = vld [vmem:[%s2554_s6 + $0x10] sm:$0xff]  ;;  %v576_v49 = vld [vmem:[%s2554_s6 + $0x260] sm:$0xff]  ;;  %v627_v50 = vld [vmem:[%s2554_s6 + $0x3f8] sm:$0xff] }
  0x49   : > { %724 = vmatpush1.msra.mxu0 %v558_v55  ;;  %683 = vmatpush2.msra.mxu1 %v624_v0  ;;  %v573_v51 = vld [vmem:[%s2554_s6 + $0x248] sm:$0xff]  ;;  %v626_v52 = vld [vmem:[%s2554_s6 + $0x3f0] sm:$0xff]  ;;  %v572_v53 = vld [vmem:[%s2554_s6 + $0x240] sm:$0xff] }
  0x4a   : > { %725 = vmatprep.subr.mxu0 %v555_v57  ;;  %684 = vmatprep.subr.mxu1 %v621_v2  ;;  %v623_v54 = vld [vmem:[%s2554_s6 + $0x3d8] sm:$0xff]  ;;  %v569_v55 = vld [vmem:[%s2554_s6 + $0x228] sm:$0xff]  ;;  %v622_v56 = vld [vmem:[%s2554_s6 + $0x3d0] sm:$0xff] }
  0x4b   : > { %726 = vmatpush1.msra.mxu0 %v554_v59  ;;  %685 = vmatpush2.msra.mxu1 %v620_v4  ;;  %v568_v57 = vld [vmem:[%s2554_s6 + $0x220] sm:$0xff]  ;;  %v619_v58 = vld [vmem:[%s2554_s6 + $0x3b8] sm:$0xff]  ;;  %v565_v59 = vld [vmem:[%s2554_s6 + $0x208] sm:$0xff] }
  0x4c   : > { %727 = vmatprep.subr.mxu0 %v551_v61  ;;  %686 = vmatprep.subr.mxu1 %v617_v7  ;;  %v618_v60 = vld [vmem:[%s2554_s6 + $0x3b0] sm:$0xff]  ;;  %v615_v61 = vld [vmem:[%s2554_s6 + $0x398] sm:$0xff] }
  0x4d   : > { %728 = vmatpush1.msra.mxu0 %v550_v63  ;;  %687 = vmatpush2.msra.mxu1 %v616_v9  ;;  %v614_v62 = vld [vmem:[%s2554_s6 + $0x390] sm:$0xff]  ;;  %v611_v63 = vld [vmem:[%s2554_s6 + $0x378] sm:$0xff] }
  0x4e   : > { %729 = vmatprep.subr.mxu0 %v547_v1  ;;  %688 = vmatprep.subr.mxu1 %v613_v11  ;;  %v610_v0 = vld [vmem:[%s2554_s6 + $0x370] sm:$0xff]  ;;  %v607_v1 = vld [vmem:[%s2554_s6 + $0x358] sm:$0xff] }
  0x4f   : > { %730 = vmatpush1.msra.mxu0 %v546_v3  ;;  %689 = vmatpush2.msra.mxu1 %v612_v13  ;;  %v606_v2 = vld [vmem:[%s2554_s6 + $0x350] sm:$0xff]  ;;  %v603_v3 = vld [vmem:[%s2554_s6 + $0x338] sm:$0xff] }
  0x50   : > { %731 = vmatprep.subr.mxu0 %v543_v5  ;;  %690 = vmatprep.subr.mxu1 %v609_v15  ;;  %v602_v4 = vld [vmem:[%s2554_s6 + $0x330] sm:$0xff]  ;;  %v599_v5 = vld [vmem:[%s2554_s6 + $0x318] sm:$0xff] }
  0x51   : > { %732 = vmatpush1.msra.mxu0 %v542_v8  ;;  %691 = vmatpush2.msra.mxu1 %v608_v17  ;;  %v598_v7 = vld [vmem:[%s2554_s6 + $0x310] sm:$0xff]  ;;  %v595_v8 = vld [vmem:[%s2554_s6 + $0x2f8] sm:$0xff] }
  0x52   : > { %733 = vmatprep.subr.mxu0 %v539_v10  ;;  %692 = vmatprep.subr.mxu1 %v605_v19  ;;  %v594_v9 = vld [vmem:[%s2554_s6 + $0x2f0] sm:$0xff]  ;;  %v591_v10 = vld [vmem:[%s2554_s6 + $0x2d8] sm:$0xff] }
  0x53   : > { %734 = vmatpush1.msra.mxu0 %v538_v12  ;;  %693 = vmatpush2.msra.mxu1 %v604_v21  ;;  %v590_v11 = vld [vmem:[%s2554_s6 + $0x2d0] sm:$0xff]  ;;  %v587_v12 = vld [vmem:[%s2554_s6 + $0x2b8] sm:$0xff] }
  0x54   : > { %735 = vmatprep.subr.mxu0 %v535_v14  ;;  %694 = vmatprep.subr.mxu1 %v601_v23  ;;  %v586_v13 = vld [vmem:[%s2554_s6 + $0x2b0] sm:$0xff]  ;;  %v583_v14 = vld [vmem:[%s2554_s6 + $0x298] sm:$0xff]  ;;  %v564_v23 = vld [vmem:[%s2554_s6 + $0x200] sm:$0xff] }
  0x55   : > { %736 = vmatpush1.msra.mxu0 %v534_v16  ;;  %695 = vmatpush2.msra.mxu1 %v600_v25  ;;  %v582_v15 = vld [vmem:[%s2554_s6 + $0x290] sm:$0xff]  ;;  %v579_v16 = vld [vmem:[%s2554_s6 + $0x278] sm:$0xff] }
  0x56   : > { %737 = vmatprep.subr.mxu0 %v531_v18  ;;  %696 = vmatprep.subr.mxu1 %v597_v27  ;;  %v578_v17 = vld [vmem:[%s2554_s6 + $0x270] sm:$0xff]  ;;  %v575_v18 = vld [vmem:[%s2554_s6 + $0x258] sm:$0xff] }
  0x57   : > { %738 = vmatpush1.msra.mxu0 %v530_v20  ;;  %697 = vmatpush2.msra.mxu1 %v596_v29  ;;  %v574_v19 = vld [vmem:[%s2554_s6 + $0x250] sm:$0xff]  ;;  %v571_v20 = vld [vmem:[%s2554_s6 + $0x238] sm:$0xff] }
  0x58   : > { %739 = vmatprep.subr.mxu0 %v527_v22  ;;  %698 = vmatprep.subr.mxu1 %v593_v31  ;;  %v570_v21 = vld [vmem:[%s2554_s6 + $0x230] sm:$0xff]  ;;  %v567_v22 = vld [vmem:[%s2554_s6 + $0x218] sm:$0xff]  ;;  %v877_v31 = vld [vmem:[%s2556_s8 + $0x1c8] sm:$0xff] }
  0x59   : > { %740 = vmatpush1.msra.mxu0 %v526_v24  ;;  %699 = vmatpush2.msra.mxu1 %v592_v33  ;;  %v498_v24 = vld [vmem:[#allocation2] sm:$0xff]  ;;  %v566_v25 = vld [vmem:[%s2554_s6 + $0x210] sm:$0xff]  ;;  %v883_v27 = vld [vmem:[%s2556_s8 + $0x1f8] sm:$0xff] }
  0x5a   : > { %741 = vmatprep.subr.mxu0 %v523_v26  ;;  %700 = vmatprep.subr.mxu1 %v589_v35  ;;  %v881_v26 = vld [vmem:[%s2556_s8 + $0x1e8] sm:$0xff]  ;;  %v882_v29 = vld [vmem:[%s2556_s8 + $0x1f0] sm:$0xff]  ;;  %v876_v33 = vld [vmem:[%s2556_s8 + $0x1c0] sm:$0xff] }
  0x5b   : > { %742 = vmatpush1.msra.mxu0 %v522_v28  ;;  %701 = vmatpush2.msra.mxu1 %v588_v37  ;;  %v880_v28 = vld [vmem:[%s2556_s8 + $0x1e0] sm:$0xff]  ;;  %v875_v37 = vld [vmem:[%s2556_s8 + $0x1b8] sm:$0xff] }
  0x5c   : > { %743 = vmatprep.subr.mxu0 %v519_v30  ;;  %702 = vmatprep.subr.mxu1 %v585_v39  ;;  %v874_v39 = vld [vmem:[%s2556_s8 + $0x1b0] sm:$0xff] }
  0x5d   : > { %744 = vmatpush1.msra.mxu0 %v518_v32  ;;  %703 = vmatpush2.msra.mxu1 %v584_v41  ;;  %v879_v32 = vld [vmem:[%s2556_s8 + $0x1d8] sm:$0xff] }
  0x5e   : > { %745 = vmatprep.subr.mxu0 %v515_v34  ;;  %704 = vmatprep.subr.mxu1 %v581_v43  ;;  %v878_v34 = vld [vmem:[%s2556_s8 + $0x1d0] sm:$0xff]  ;;  %v871_v41 = vld [vmem:[%s2556_s8 + $0x198] sm:$0xff] }
  0x5f   : > { %746 = vmatpush1.msra.mxu0 %v514_v36  ;;  %705 = vmatpush2.msra.mxu1 %v580_v45  ;;  %v873_v36 = vld [vmem:[%s2556_s8 + $0x1a8] sm:$0xff]  ;;  %v870_v43 = vld [vmem:[%s2556_s8 + $0x190] sm:$0xff]  ;;  %v867_v45 = vld [vmem:[%s2556_s8 + $0x178] sm:$0xff] }
  0x60   : > { %747 = vmatprep.subr.mxu0 %v511_v38  ;;  %706 = vmatprep.subr.mxu1 %v577_v47  ;;  %v872_v38 = vld [vmem:[%s2556_s8 + $0x1a0] sm:$0xff]  ;;  %v866_v47 = vld [vmem:[%s2556_s8 + $0x170] sm:$0xff] }
  0x61   : > { %748 = vmatpush1.msra.mxu0 %v510_v40  ;;  %707 = vmatpush2.msra.mxu1 %v576_v49  ;;  %v869_v40 = vld [vmem:[%s2556_s8 + $0x188] sm:$0xff]  ;;  %v863_v49 = vld [vmem:[%s2556_s8 + $0x158] sm:$0xff] }
  0x62   : > { %749 = vmatprep.subr.mxu0 %v507_v42  ;;  %708 = vmatprep.subr.mxu1 %v573_v51  ;;  %v868_v42 = vld [vmem:[%s2556_s8 + $0x180] sm:$0xff]  ;;  %v862_v51 = vld [vmem:[%s2556_s8 + $0x150] sm:$0xff] }
  0x63   : > { %750 = vmatpush1.msra.mxu0 %v506_v44  ;;  %709 = vmatpush2.msra.mxu1 %v572_v53  ;;  %v865_v44 = vld [vmem:[%s2556_s8 + $0x168] sm:$0xff]  ;;  %v859_v53 = vld [vmem:[%s2556_s8 + $0x138] sm:$0xff] }
  0x64   : > { %751 = vmatprep.subr.mxu0 %v503_v46  ;;  %710 = vmatprep.subr.mxu1 %v569_v55  ;;  %v864_v46 = vld [vmem:[%s2556_s8 + $0x160] sm:$0xff]  ;;  %v858_v55 = vld [vmem:[%s2556_s8 + $0x130] sm:$0xff] }
  0x65   : > { %752 = vmatpush1.msra.mxu0 %v502_v48  ;;  %711 = vmatpush2.msra.mxu1 %v568_v57  ;;  %v861_v48 = vld [vmem:[%s2556_s8 + $0x148] sm:$0xff]  ;;  %v855_v57 = vld [vmem:[%s2556_s8 + $0x118] sm:$0xff] }
  0x66   : > { %753 = vmatprep.subr.mxu0 %v627_v50  ;;  %712 = vmatprep.subr.mxu1 %v565_v59  ;;  %v860_v50 = vld [vmem:[%s2556_s8 + $0x140] sm:$0xff]  ;;  %v854_v59 = vld [vmem:[%s2556_s8 + $0x110] sm:$0xff] }
  0x67   : > { %754 = vmatpush2.msra.mxu0 %v626_v52  ;;  %713 = vmatpush2.msra.mxu1 %v564_v23  ;;  %v857_v52 = vld [vmem:[%s2556_s8 + $0x128] sm:$0xff]  ;;  %v824_v23 = vld [vmem:[%s2556_s8 + $0x20] sm:$0xff] }
  0x68   : > { %755 = vmatprep.subr.mxu0 %v623_v54  ;;  %714 = vmatprep.mubr.f32.mxu1 %v498_v24  ;;  %v856_v54 = vld [vmem:[%s2556_s8 + $0x120] sm:$0xff] }
  0x69   : > { %756 = vmatpush2.msra.mxu0 %v622_v56  ;;  %785 = vmatprep.mubr.f32.mxu0 %v498_v24  ;;  %v853_v56 = vld [vmem:[%s2556_s8 + $0x108] sm:$0xff]  ;;  %v826_v24 = vld [vmem:[%s2556_s8 + $0x30] sm:$0xff] }
  0x6a   : > { %757 = vmatprep.subr.mxu0 %v619_v58  ;;  %970 = vmatprep.subr.mxu1 %v881_v26  ;;  %v852_v58 = vld [vmem:[%s2556_s8 + $0x100] sm:$0xff]  ;;  %v823_v26 = vld [vmem:[%s2556_s8 + $0x18] sm:$0xff] }
  0x6b   : > { %758 = vmatpush2.msra.mxu0 %v618_v60  ;;  %v849_v60 = vld [vmem:[%s2556_s8 + $0xe8] sm:$0xff] }
  0x6c   : > { %759 = vmatprep.subr.mxu0 %v615_v61  ;;  %v851_v61 = vld [vmem:[%s2556_s8 + $0xf8] sm:$0xff] }
  0x6d   : > { %760 = vmatpush2.msra.mxu0 %v614_v62  ;;  %v848_v62 = vld [vmem:[%s2556_s8 + $0xe0] sm:$0xff] }
  0x6e   : > { %761 = vmatprep.subr.mxu0 %v611_v63  ;;  %v850_v63 = vld [vmem:[%s2556_s8 + $0xf0] sm:$0xff] }
  0x6f   : > { %762 = vmatpush2.msra.mxu0 %v610_v0  ;;  %v845_v0 = vld [vmem:[%s2556_s8 + $0xc8] sm:$0xff] }
  0x70   : > { %763 = vmatprep.subr.mxu0 %v607_v1  ;;  %v847_v1 = vld [vmem:[%s2556_s8 + $0xd8] sm:$0xff] }
  0x71   : > { %764 = vmatpush2.msra.mxu0 %v606_v2  ;;  %v844_v2 = vld [vmem:[%s2556_s8 + $0xc0] sm:$0xff] }
  0x72   : > { %765 = vmatprep.subr.mxu0 %v603_v3  ;;  %v846_v3 = vld [vmem:[%s2556_s8 + $0xd0] sm:$0xff] }
  0x73   : > { %766 = vmatpush2.msra.mxu0 %v602_v4  ;;  %v841_v4 = vld [vmem:[%s2556_s8 + $0xa8] sm:$0xff] }
  0x74   : > { %767 = vmatprep.subr.mxu0 %v599_v5  ;;  %v843_v5 = vld [vmem:[%s2556_s8 + $0xb8] sm:$0xff] }
  0x75   : > { %768 = vmatpush2.msra.mxu0 %v598_v7  ;;  %v840_v7 = vld [vmem:[%s2556_s8 + $0xa0] sm:$0xff] }
  0x76   : > { %769 = vmatprep.subr.mxu0 %v595_v8  ;;  %v842_v8 = vld [vmem:[%s2556_s8 + $0xb0] sm:$0xff] }
  0x77   : > { %770 = vmatpush2.msra.mxu0 %v594_v9  ;;  %v837_v9 = vld [vmem:[%s2556_s8 + $0x88] sm:$0xff] }
  0x78   : > { %771 = vmatprep.subr.mxu0 %v591_v10  ;;  %v839_v10 = vld [vmem:[%s2556_s8 + $0x98] sm:$0xff] }
  0x79   : > { %772 = vmatpush2.msra.mxu0 %v590_v11  ;;  %v836_v11 = vld [vmem:[%s2556_s8 + $0x80] sm:$0xff] }
  0x7a   : > { %773 = vmatprep.subr.mxu0 %v587_v12  ;;  %v838_v12 = vld [vmem:[%s2556_s8 + $0x90] sm:$0xff] }
  0x7b   : > { %774 = vmatpush2.msra.mxu0 %v586_v13  ;;  %v833_v13 = vld [vmem:[%s2556_s8 + $0x68] sm:$0xff] }
  0x7c   : > { %775 = vmatprep.subr.mxu0 %v583_v14  ;;  %v835_v14 = vld [vmem:[%s2556_s8 + $0x78] sm:$0xff] }
  0x7d   : > { %776 = vmatpush2.msra.mxu0 %v582_v15  ;;  %v832_v15 = vld [vmem:[%s2556_s8 + $0x60] sm:$0xff] }
  0x7e   : > { %777 = vmatprep.subr.mxu0 %v579_v16  ;;  %v834_v16 = vld [vmem:[%s2556_s8 + $0x70] sm:$0xff] }
  0x7f   : > { %778 = vmatpush2.msra.mxu0 %v578_v17  ;;  %v829_v17 = vld [vmem:[%s2556_s8 + $0x48] sm:$0xff] }
  0x80   : > { %779 = vmatprep.subr.mxu0 %v575_v18  ;;  %v831_v18 = vld [vmem:[%s2556_s8 + $0x58] sm:$0xff] }
  0x81   : > { %780 = vmatpush2.msra.mxu0 %v574_v19  ;;  %v828_v19 = vld [vmem:[%s2556_s8 + $0x40] sm:$0xff] }
  0x82   : > { %781 = vmatprep.subr.mxu0 %v571_v20  ;;  %v830_v20 = vld [vmem:[%s2556_s8 + $0x50] sm:$0xff] }
  0x83   : > { %782 = vmatpush2.msra.mxu0 %v570_v21  ;;  %v825_v21 = vld [vmem:[%s2556_s8 + $0x28] sm:$0xff] }
  0x84   : > { %783 = vmatprep.subr.mxu0 %v567_v22  ;;  %v827_v22 = vld [vmem:[%s2556_s8 + $0x38] sm:$0xff] }
  0x85   : > { %784 = vmatpush2.msra.mxu0 %v566_v25  ;;  %v821_v25 = vld [vmem:[%s2556_s8 + $0x8] sm:$0xff] }
  0x86   : > { %1041 = vmatprep.subr.mxu0 %v883_v27  ;;  %v820_v27 = vld [vmem:[%s2556_s8] sm:$0xff] }
 0x106   : > { %v494_v30 = vpop.f32.mrf.mxu0 }
 0x107   : > { %715 = vmatmul.mubr.f32.vlgmr.msra.gmra.mxu1 %v494_v30  ;;  %786 = vmatmul.mubr.f32.vlgmr.msra.gmra.mxu0 %v494_v30  ;;  %v947_v30 = vld [vmem:[%s2556_s8 + $0x3f8] sm:$0xff] }
 0x108   : > { %v1399_v35 = vpop.f32.mrf.mxu0  ;;  %971 = vmatpush1.msra.mxu1 %v880_v28  ;;  %1042 = vmatpush1.msra.mxu0 %v882_v29  ;;  %v822_v28 = vld [vmem:[%s2556_s8 + $0x10] sm:$0xff]  ;;  %v945_v29 = vld [vmem:[%s2556_s8 + $0x3e8] sm:$0xff] }
 0x109   : > { %972 = vmatprep.subr.mxu1 %v877_v31  ;;  %1043 = vmatprep.subr.mxu0 %v879_v32  ;;  %v944_v31 = vld [vmem:[%s2556_s8 + $0x3e0] sm:$0xff]  ;;  %v946_v32 = vld [vmem:[%s2556_s8 + $0x3f0] sm:$0xff] }
 0x10a   : > { %973 = vmatpush1.msra.mxu1 %v876_v33  ;;  %1044 = vmatpush1.msra.mxu0 %v878_v34  ;;  %v941_v33 = vld [vmem:[%s2556_s8 + $0x3c8] sm:$0xff]  ;;  %v943_v34 = vld [vmem:[%s2556_s8 + $0x3d8] sm:$0xff]  ;;  %v940_v35 = vld [vmem:[%s2556_s8 + $0x3c0] sm:$0xff] }
 0x10b   : > { %974 = vmatprep.subr.mxu1 %v873_v36  ;;  %1045 = vmatprep.subr.mxu0 %v875_v37  ;;  %v942_v36 = vld [vmem:[%s2556_s8 + $0x3d0] sm:$0xff]  ;;  %v937_v37 = vld [vmem:[%s2556_s8 + $0x3a8] sm:$0xff] }
 0x10c   : > { %975 = vmatpush1.msra.mxu1 %v872_v38  ;;  %1046 = vmatpush1.msra.mxu0 %v874_v39  ;;  %v939_v38 = vld [vmem:[%s2556_s8 + $0x3b8] sm:$0xff]  ;;  %v936_v39 = vld [vmem:[%s2556_s8 + $0x3a0] sm:$0xff] }
 0x10d   : > { %976 = vmatprep.subr.mxu1 %v869_v40  ;;  %1047 = vmatprep.subr.mxu0 %v871_v41  ;;  %v938_v40 = vld [vmem:[%s2556_s8 + $0x3b0] sm:$0xff]  ;;  %v933_v41 = vld [vmem:[%s2556_s8 + $0x388] sm:$0xff] }
 0x10e   : > { %977 = vmatpush1.msra.mxu1 %v868_v42  ;;  %1048 = vmatpush1.msra.mxu0 %v870_v43  ;;  %v935_v42 = vld [vmem:[%s2556_s8 + $0x398] sm:$0xff]  ;;  %v932_v43 = vld [vmem:[%s2556_s8 + $0x380] sm:$0xff] }
 0x10f   : > { %978 = vmatprep.subr.mxu1 %v865_v44  ;;  %1049 = vmatprep.subr.mxu0 %v867_v45  ;;  %v934_v44 = vld [vmem:[%s2556_s8 + $0x390] sm:$0xff]  ;;  %v929_v45 = vld [vmem:[%s2556_s8 + $0x368] sm:$0xff] }
 0x110   : > { %979 = vmatpush1.msra.mxu1 %v864_v46  ;;  %1050 = vmatpush1.msra.mxu0 %v866_v47  ;;  %v931_v46 = vld [vmem:[%s2556_s8 + $0x378] sm:$0xff]  ;;  %v928_v47 = vld [vmem:[%s2556_s8 + $0x360] sm:$0xff] }
 0x111   : > { %980 = vmatprep.subr.mxu1 %v861_v48  ;;  %1051 = vmatprep.subr.mxu0 %v863_v49  ;;  %v930_v48 = vld [vmem:[%s2556_s8 + $0x370] sm:$0xff]  ;;  %v925_v49 = vld [vmem:[%s2556_s8 + $0x348] sm:$0xff] }
 0x112   : > { %981 = vmatpush1.msra.mxu1 %v860_v50  ;;  %1052 = vmatpush1.msra.mxu0 %v862_v51  ;;  %v927_v50 = vld [vmem:[%s2556_s8 + $0x358] sm:$0xff]  ;;  %v924_v51 = vld [vmem:[%s2556_s8 + $0x340] sm:$0xff] }
 0x113   : > { %982 = vmatprep.subr.mxu1 %v857_v52  ;;  %1053 = vmatprep.subr.mxu0 %v859_v53  ;;  %v926_v52 = vld [vmem:[%s2556_s8 + $0x350] sm:$0xff]  ;;  %v921_v53 = vld [vmem:[%s2556_s8 + $0x328] sm:$0xff] }
 0x114   : > { %983 = vmatpush1.msra.mxu1 %v856_v54  ;;  %1054 = vmatpush1.msra.mxu0 %v858_v55  ;;  %v923_v54 = vld [vmem:[%s2556_s8 + $0x338] sm:$0xff]  ;;  %v920_v55 = vld [vmem:[%s2556_s8 + $0x320] sm:$0xff] }
 0x115   : > { %984 = vmatprep.subr.mxu1 %v853_v56  ;;  %1055 = vmatprep.subr.mxu0 %v855_v57  ;;  %v922_v56 = vld [vmem:[%s2556_s8 + $0x330] sm:$0xff]  ;;  %v917_v57 = vld [vmem:[%s2556_s8 + $0x308] sm:$0xff] }
 0x116   : > { %985 = vmatpush1.msra.mxu1 %v852_v58  ;;  %1056 = vmatpush1.msra.mxu0 %v854_v59  ;;  %v919_v58 = vld [vmem:[%s2556_s8 + $0x318] sm:$0xff]  ;;  %v916_v59 = vld [vmem:[%s2556_s8 + $0x300] sm:$0xff] }
 0x117   : > { %986 = vmatprep.subr.mxu1 %v849_v60  ;;  %1057 = vmatprep.subr.mxu0 %v851_v61  ;;  %v918_v60 = vld [vmem:[%s2556_s8 + $0x310] sm:$0xff]  ;;  %v913_v61 = vld [vmem:[%s2556_s8 + $0x2e8] sm:$0xff] }
 0x118   : > { %987 = vmatpush1.msra.mxu1 %v848_v62  ;;  %1058 = vmatpush1.msra.mxu0 %v850_v63  ;;  %v915_v62 = vld [vmem:[%s2556_s8 + $0x2f8] sm:$0xff]  ;;  %v912_v63 = vld [vmem:[%s2556_s8 + $0x2e0] sm:$0xff] }
 0x119   : > { %988 = vmatprep.subr.mxu1 %v845_v0  ;;  %1059 = vmatprep.subr.mxu0 %v847_v1  ;;  %v914_v0 = vld [vmem:[%s2556_s8 + $0x2f0] sm:$0xff]  ;;  %v909_v1 = vld [vmem:[%s2556_s8 + $0x2c8] sm:$0xff] }
 0x11a   : > { %989 = vmatpush1.msra.mxu1 %v844_v2  ;;  %1060 = vmatpush1.msra.mxu0 %v846_v3  ;;  %v911_v2 = vld [vmem:[%s2556_s8 + $0x2d8] sm:$0xff]  ;;  %v908_v3 = vld [vmem:[%s2556_s8 + $0x2c0] sm:$0xff] }
 0x11b   : > { %990 = vmatprep.subr.mxu1 %v841_v4  ;;  %1061 = vmatprep.subr.mxu0 %v843_v5  ;;  %v910_v4 = vld [vmem:[%s2556_s8 + $0x2d0] sm:$0xff]  ;;  %v905_v5 = vld [vmem:[%s2556_s8 + $0x2a8] sm:$0xff] }
 0x11c   : > { %991 = vmatpush1.msra.mxu1 %v840_v7  ;;  %1062 = vmatpush1.msra.mxu0 %v842_v8  ;;  %v907_v7 = vld [vmem:[%s2556_s8 + $0x2b8] sm:$0xff]  ;;  %v904_v8 = vld [vmem:[%s2556_s8 + $0x2a0] sm:$0xff] }
 0x11d   : > { %992 = vmatprep.subr.mxu1 %v837_v9  ;;  %1063 = vmatprep.subr.mxu0 %v839_v10  ;;  %v906_v9 = vld [vmem:[%s2556_s8 + $0x2b0] sm:$0xff]  ;;  %v901_v10 = vld [vmem:[%s2556_s8 + $0x288] sm:$0xff] }
 0x11e   : > { %993 = vmatpush1.msra.mxu1 %v836_v11  ;;  %1064 = vmatpush1.msra.mxu0 %v838_v12  ;;  %v903_v11 = vld [vmem:[%s2556_s8 + $0x298] sm:$0xff]  ;;  %v900_v12 = vld [vmem:[%s2556_s8 + $0x280] sm:$0xff] }
 0x11f   : > { %994 = vmatprep.subr.mxu1 %v833_v13  ;;  %1065 = vmatprep.subr.mxu0 %v835_v14  ;;  %v902_v13 = vld [vmem:[%s2556_s8 + $0x290] sm:$0xff]  ;;  %v897_v14 = vld [vmem:[%s2556_s8 + $0x268] sm:$0xff] }
 0x120   : > { %995 = vmatpush1.msra.mxu1 %v832_v15  ;;  %1066 = vmatpush1.msra.mxu0 %v834_v16  ;;  %v899_v15 = vld [vmem:[%s2556_s8 + $0x278] sm:$0xff]  ;;  %v896_v16 = vld [vmem:[%s2556_s8 + $0x260] sm:$0xff] }
 0x121   : > { %996 = vmatprep.subr.mxu1 %v829_v17  ;;  %1067 = vmatprep.subr.mxu0 %v831_v18  ;;  %v898_v17 = vld [vmem:[%s2556_s8 + $0x270] sm:$0xff]  ;;  %v893_v18 = vld [vmem:[%s2556_s8 + $0x248] sm:$0xff] }
 0x122   : > { %997 = vmatpush1.msra.mxu1 %v828_v19  ;;  %1068 = vmatpush1.msra.mxu0 %v830_v20  ;;  %v895_v19 = vld [vmem:[%s2556_s8 + $0x258] sm:$0xff]  ;;  %v892_v20 = vld [vmem:[%s2556_s8 + $0x240] sm:$0xff] }
 0x123   : > { %998 = vmatprep.subr.mxu1 %v825_v21  ;;  %1069 = vmatprep.subr.mxu0 %v827_v22  ;;  %v894_v21 = vld [vmem:[%s2556_s8 + $0x250] sm:$0xff]  ;;  %v889_v22 = vld [vmem:[%s2556_s8 + $0x228] sm:$0xff] }
 0x124   : > { %999 = vmatpush1.msra.mxu1 %v824_v23  ;;  %1070 = vmatpush1.msra.mxu0 %v826_v24  ;;  %v891_v23 = vld [vmem:[%s2556_s8 + $0x238] sm:$0xff]  ;;  %v888_v24 = vld [vmem:[%s2556_s8 + $0x220] sm:$0xff] }
 0x125   : > { %1000 = vmatprep.subr.mxu1 %v821_v25  ;;  %1071 = vmatprep.subr.mxu0 %v823_v26  ;;  %v890_v25 = vld [vmem:[%s2556_s8 + $0x230] sm:$0xff]  ;;  %v885_v26 = vld [vmem:[%s2556_s8 + $0x208] sm:$0xff] }
 0x126   : > { %1001 = vmatpush1.msra.mxu1 %v820_v27  ;;  %1072 = vmatpush1.msra.mxu0 %v822_v28  ;;  %v887_v27 = vld [vmem:[%s2556_s8 + $0x218] sm:$0xff]  ;;  %v884_v28 = vld [vmem:[%s2556_s8 + $0x200] sm:$0xff] }
 0x127   : > { %1002 = vmatprep.subr.mxu1 %v945_v29  ;;  %1073 = vmatprep.subr.mxu0 %v947_v30  ;;  %v817_v29 = vld [vmem:[#allocation2 + $0x8] sm:$0xff]  ;;  %v886_v30 = vld [vmem:[%s2556_s8 + $0x210] sm:$0xff] }
 0x128   : > { %1003 = vmatpush2.msra.mxu1 %v944_v31  ;;  %1074 = vmatpush2.msra.mxu0 %v946_v32  ;;  %v630_v31 = vlaneseq }
 0x129   : > { %1004 = vmatprep.subr.mxu1 %v941_v33  ;;  %1075 = vmatprep.subr.mxu0 %v943_v34  ;;  %v628_v34 = vld [vmem:[%s2555_s7] sm:$0xf] }
 0x12a   : > { %1005 = vmatpush2.msra.mxu1 %v940_v35  ;;  %1076 = vmatpush2.msra.mxu0 %v942_v36  ;;  %v2444_v32 = vshrl.u32 %v630_v31, 7 }
 0x12b   : > { %1006 = vmatprep.subr.mxu1 %v937_v37  ;;  %1077 = vmatprep.subr.mxu0 %v939_v38 }
 0x12c   : > { %1007 = vmatpush2.msra.mxu1 %v936_v39  ;;  %1078 = vmatpush2.msra.mxu0 %v938_v40  ;;  %v632_v33 = vsub.s32 0, %v2444_v32  ;;  %v636_v35 = vsub.s32 1, %v2444_v32 }
 0x12d   : > { %1008 = vmatprep.subr.mxu1 %v933_v41  ;;  %1079 = vmatprep.subr.mxu0 %v935_v42 }
 0x12e   : > { %1009 = vmatpush2.msra.mxu1 %v932_v43  ;;  %1080 = vmatpush2.msra.mxu0 %v934_v44  ;;  %v633_v36 = vrot.slane %v628_v34, %v632_v33  ;;  %v637_v37 = vrot.slane %v628_v34, %v636_v35  ;;  %v644_v43 = vsub.s32 3, %v2444_v32 }
 0x12f   : > { %1010 = vmatprep.subr.mxu1 %v929_v45  ;;  %1081 = vmatprep.subr.mxu0 %v931_v46 }
 0x130   : > { %1011 = vmatpush2.msra.mxu1 %v928_v47  ;;  %1082 = vmatpush2.msra.mxu0 %v930_v48  ;;  %v645_v46 = vrot.slane %v628_v34, %v644_v43  ;;  %v640_v48 = vsub.s32 2, %v2444_v32 }
 0x131   : > { %1012 = vmatprep.subr.mxu1 %v925_v49  ;;  %1083 = vmatprep.subr.mxu0 %v927_v50 }
 0x132   : > { %1013 = vmatpush2.msra.mxu1 %v924_v51  ;;  %1084 = vmatpush2.msra.mxu0 %v926_v52  ;;  %v641_v50 = vrot.slane %v628_v34, %v640_v48 }
 0x133   : > { %1014 = vmatprep.subr.mxu1 %v921_v53  ;;  %1085 = vmatprep.subr.mxu0 %v923_v54 }
 0x134   : > { %1015 = vmatpush2.msra.mxu1 %v920_v55  ;;  %1086 = vmatpush2.msra.mxu0 %v922_v56 }
 0x135   : > { %1016 = vmatprep.subr.mxu1 %v917_v57  ;;  %1087 = vmatprep.subr.mxu0 %v919_v58 }
 0x136   : > { %1017 = vmatpush2.msra.mxu1 %v916_v59  ;;  %1088 = vmatpush2.msra.mxu0 %v918_v60  ;;  %v499_v59 = vld [vmem:[#allocation3 + $0x8] sm:$0xff] }
 0x137   : > { %1018 = vmatprep.subr.mxu1 %v913_v61  ;;  %1089 = vmatprep.subr.mxu0 %v915_v62 }
 0x138   : > { %1019 = vmatpush2.msra.mxu1 %v912_v63  ;;  %1090 = vmatpush2.msra.mxu0 %v914_v0 }
 0x139   : > { %1020 = vmatprep.subr.mxu1 %v909_v1  ;;  %1091 = vmatprep.subr.mxu0 %v911_v2 }
 0x13a   : > { %1021 = vmatpush2.msra.mxu1 %v908_v3  ;;  %1092 = vmatpush2.msra.mxu0 %v910_v4 }
 0x13b   : > { %1022 = vmatprep.subr.mxu1 %v905_v5  ;;  %1093 = vmatprep.subr.mxu0 %v907_v7  ;;  %v1155_v5 = vld [vmem:[%s2558_s10 + $0x78] sm:$0xff]  ;;  %v1154_v7 = vld [vmem:[%s2558_s10 + $0x70] sm:$0xff] }
 0x13c   : > { %1023 = vmatpush2.msra.mxu1 %v904_v8  ;;  %1094 = vmatpush2.msra.mxu0 %v906_v9  ;;  %v1153_v8 = vld [vmem:[%s2558_s10 + $0x68] sm:$0xff]  ;;  %v1152_v9 = vld [vmem:[%s2558_s10 + $0x60] sm:$0xff] }
 0x13d   : > { %1024 = vmatprep.subr.mxu1 %v901_v10  ;;  %1095 = vmatprep.subr.mxu0 %v903_v11  ;;  %v1151_v10 = vld [vmem:[%s2558_s10 + $0x58] sm:$0xff]  ;;  %v1150_v11 = vld [vmem:[%s2558_s10 + $0x50] sm:$0xff] }
 0x13e   : > { %1025 = vmatpush2.msra.mxu1 %v900_v12  ;;  %1096 = vmatpush2.msra.mxu0 %v902_v13  ;;  %v1149_v12 = vld [vmem:[%s2558_s10 + $0x48] sm:$0xff]  ;;  %v1148_v13 = vld [vmem:[%s2558_s10 + $0x40] sm:$0xff] }
 0x13f   : > { %1026 = vmatprep.subr.mxu1 %v897_v14  ;;  %1097 = vmatprep.subr.mxu0 %v899_v15  ;;  %v1147_v14 = vld [vmem:[%s2558_s10 + $0x38] sm:$0xff]  ;;  %v1146_v15 = vld [vmem:[%s2558_s10 + $0x30] sm:$0xff] }
 0x140   : > { %1027 = vmatpush2.msra.mxu1 %v896_v16  ;;  %1098 = vmatpush2.msra.mxu0 %v898_v17  ;;  %v1145_v16 = vld [vmem:[%s2558_s10 + $0x28] sm:$0xff]  ;;  %v1144_v17 = vld [vmem:[%s2558_s10 + $0x20] sm:$0xff] }
 0x141   : > { %1028 = vmatprep.subr.mxu1 %v893_v18  ;;  %1099 = vmatprep.subr.mxu0 %v895_v19  ;;  %v1143_v18 = vld [vmem:[%s2558_s10 + $0x18] sm:$0xff]  ;;  %v1142_v19 = vld [vmem:[%s2558_s10 + $0x10] sm:$0xff] }
 0x142   : > { %1029 = vmatpush2.msra.mxu1 %v892_v20  ;;  %1100 = vmatpush2.msra.mxu0 %v894_v21  ;;  %v1141_v20 = vld [vmem:[%s2558_s10 + $0x8] sm:$0xff]  ;;  %v1140_v21 = vld [vmem:[%s2558_s10] sm:$0xff] }
 0x143   : > { %1030 = vmatprep.subr.mxu1 %v889_v22  ;;  %1101 = vmatprep.subr.mxu0 %v891_v23  ;;  %v948_v22 = vld [vmem:[%s2557_s9] sm:$0xf] }
 0x144   : > { %1031 = vmatpush2.msra.mxu1 %v888_v24  ;;  %1102 = vmatpush2.msra.mxu0 %v890_v25  ;;  %v953_v23 = vrot.slane %v948_v22, %v632_v33  ;;  %v957_v24 = vrot.slane %v948_v22, %v636_v35  ;;  %v961_v33 = vrot.slane %v948_v22, %v640_v48 }
 0x145   : > { %1032 = vmatprep.subr.mxu1 %v885_v26  ;;  %1103 = vmatprep.subr.mxu0 %v887_v27 }
 0x146   : > { %1033 = vmatpush2.msra.mxu1 %v884_v28  ;;  %1034 = vmatprep.mubr.f32.mxu1 %v817_v29 }
 0x147   : > { %1104 = vmatpush2.msra.mxu0 %v886_v30  ;;  %1105 = vmatprep.mubr.f32.mxu0 %v817_v29 }
 0x148   : > { %1400 = vmatprep.subr.mxu1 %v1501_v6 }
 0x1c7   : > { %v716_v38 = vpop.f32.mrf.mxu1  ;;  %v787_v44 = vpop.f32.mrf.mxu0 }
 0x1c8   : > { %v717_v39 = vadd.f32 %v716_v38, %v633_v36  ;;  %v788_v53 = vadd.f32 %v787_v44, %v641_v50  ;;  %v965_v36 = vrot.slane %v948_v22, %v644_v43 }
 0x1c9   : > { %v718_v40 = vpop.f32.mrf.mxu1  ;;  %v789_v47 = vpop.f32.mrf.mxu0 }
 0x1ca   : > { %v1321_v41 = vmul.f32 -1.442695, %v717_v39  ;;  %v719_v42 = vadd.f32 %v718_v40, %v637_v37  ;;  %v790_v49 = vadd.f32 %v789_v47, %v645_v46  ;;  %v819_v47 = vld [vmem:[#allocation3] sm:$0xff] }
 0x1cc   : > { %1446 = vpow2.f32 %v1321_v41  ;;  %v1322_v45 = vmul.f32 -1.442695, %v719_v42  ;;  %v1323_v51 = vmul.f32 -1.442695, %v790_v49 }
 0x1ce   : > { %1448 = vpow2.f32 %v1322_v45 }
 0x1cf   : > { %1450 = vpow2.f32 %v1323_v51 }
 0x1d9   : > { %v1447_v52 = vpop.eup %1446 }
 0x1da   : > { %v801_v54 = vadd.f32 1.0, %v1447_v52 }
 0x1db   : > { %v1449_v55 = vpop.eup %1448 }
 0x1dc   : > { %1452 = vrcp.f32 %v801_v54  ;;  %v802_v56 = vadd.f32 1.0, %v1449_v55  ;;  %v1451_v57 = vpop.eup %1450  ;;  %v1235_v55 = vand.u32 127, %v630_v31  ;;  %v1252_v31 = vld [vmem:[%s1591_s19] sm:$0xff] }
 0x1dd   : > { %1454 = vtanh.f32 %v788_v53  ;;  %v803_v62 = vadd.f32 1.0, %v1451_v57 }
 0x1de   : > { %1456 = vrcp.f32 %v802_v56  ;;  %v1327_v56 = vld [vmem:[%s2559_s11] ss:$0 sm:$0xff]  ;;  %vm1237_vm1 = vcmp.lt.s32.totalorder %v1235_v55, 24 }
 0x1df   : > { %1458 = vrcp.f32 %v803_v62 }
 0x1e9   : > { %v1453_v58 = vpop.eup %1452 }
 0x1ea   : > { %v1455_v60 = vpop.eup %1454 }
 0x1eb   : > { %v1457_v61 = vpop.eup %1456  ;;  %v812_v63 = vmul.f32 %v1455_v60, %v1453_v58 }
 0x1ec   : > { %v811_v0 = vmul.f32 %v1457_v61, %v499_v59  ;;  %v1459_v2 = vpop.eup %1458  ;;  %v1236_v61 = vcvt.s32.f32 %v1235_v55 }
 0x1ee   : > { %v813_v1 = vadd.f32 %v812_v63, %v811_v0  ;;  %v1253_v0 = vstv %s1251_s30 }
 0x1f0   : > { %1137 = vst [vmem:[#allocation3 + $0x8] sm:$0xff] %v813_v1  ;;  %1460 = vtanh.f32 %v813_v1  ;;  %v1256_v1 = vstv %s1255_s13 }
 0x1fd   : > { %v1461_v3 = vpop.eup %1460 }
 0x1fe   : > { %v815_v4 = vmul.f32 %v1461_v3, %v1459_v2  ;;  %v1254_v3 = vmul.f32 %v1253_v0, %v1252_v31 }
 0x200   : > { %1035 = vmatmul.mubr.f32.vlgmr.msra.gmra.mxu1 %v815_v4  ;;  %1136 = vst [vmem:[#allocation2] sm:$0xff] %v815_v4  ;;  %1106 = vmatmul.mubr.f32.vlgmr.msra.gmra.mxu0 %v815_v4 }
 0x201   : > { %1432 = vmatprep.mubr.msk.f32.mxu1 %vm1502_vm0, %v1501_v6  ;;  %1401 = vmatpush3.msra.mxu1 %v1155_v5 }
 0x202   : > { %1402 = vmatprep.subr.mxu1 %v1501_v6 }
 0x203   : > { %1403 = vmatpush3.msra.mxu1 %v1154_v7 }
 0x204   : > { %1404 = vmatprep.subr.mxu1 %v1501_v6 }
 0x205   : > { %1405 = vmatpush3.msra.mxu1 %v1153_v8 }
 0x206   : > { %1406 = vmatprep.subr.mxu1 %v1501_v6 }
 0x207   : > { %1407 = vmatpush3.msra.mxu1 %v1152_v9 }
 0x208   : > { %1408 = vmatprep.subr.mxu1 %v1501_v6 }
 0x209   : > { %1409 = vmatpush3.msra.mxu1 %v1151_v10 }
 0x20a   : > { %1410 = vmatprep.subr.mxu1 %v1501_v6 }
 0x20b   : > { %1411 = vmatpush3.msra.mxu1 %v1150_v11 }
 0x20c   : > { %1412 = vmatprep.subr.mxu1 %v1501_v6 }
 0x20d   : > { %1413 = vmatpush3.msra.mxu1 %v1149_v12 }
 0x20e   : > { %1414 = vmatprep.subr.mxu1 %v1501_v6 }
 0x20f   : > { %1415 = vmatpush3.msra.mxu1 %v1148_v13 }
 0x210   : > { %1416 = vmatprep.subr.mxu1 %v1501_v6 }
 0x211   : > { %1417 = vmatpush3.msra.mxu1 %v1147_v14 }
 0x212   : > { %1418 = vmatprep.subr.mxu1 %v1501_v6 }
 0x213   : > { %1419 = vmatpush3.msra.mxu1 %v1146_v15 }
 0x214   : > { %1420 = vmatprep.subr.mxu1 %v1501_v6 }
 0x215   : > { %1421 = vmatpush3.msra.mxu1 %v1145_v16 }
 0x216   : > { %1422 = vmatprep.subr.mxu1 %v1501_v6 }
 0x217   : > { %1423 = vmatpush3.msra.mxu1 %v1144_v17 }
 0x218   : > { %1424 = vmatprep.subr.mxu1 %v1501_v6 }
 0x219   : > { %1425 = vmatpush3.msra.mxu1 %v1143_v18 }
 0x21a   : > { %1426 = vmatprep.subr.mxu1 %v1501_v6 }
 0x21b   : > { %1427 = vmatpush3.msra.mxu1 %v1142_v19 }
 0x21c   : > { %1428 = vmatprep.subr.mxu1 %v1501_v6 }
 0x21d   : > { %1429 = vmatpush3.msra.mxu1 %v1141_v20 }
 0x21e   : > { %1430 = vmatprep.subr.mxu1 %v1501_v6 }
 0x21f   : > { %1431 = vmatpush3.msra.mxu1 %v1140_v21 }
 0x2c0   : > { %v1036_v25 = vpop.f32.mrf.mxu1  ;;  %v1107_v30 = vpop.f32.mrf.mxu0 }
 0x2c1   : > { %v1037_v26 = vadd.f32 %v1036_v25, %v953_v23  ;;  %v1108_v35 = vadd.f32 %v1107_v30, %v961_v33 }
 0x2c2   : > { %v1038_v27 = vpop.f32.mrf.mxu1  ;;  %v1109_v37 = vpop.f32.mrf.mxu0 }
 0x2c3   : > { %v1324_v28 = vmul.f32 -1.442695, %v1037_v26  ;;  %v1039_v29 = vadd.f32 %v1038_v27, %v957_v24  ;;  %v1110_v38 = vadd.f32 %v1109_v37, %v965_v36 }
 0x2c5   : > { %1462 = vpow2.f32 %v1324_v28  ;;  %v1325_v34 = vmul.f32 -1.442695, %v1039_v29  ;;  %v1326_v39 = vmul.f32 -1.442695, %v1110_v38 }
 0x2c7   : > { %1464 = vpow2.f32 %v1325_v34 }
 0x2c8   : > { %1466 = vpow2.f32 %v1326_v39 }
 0x2d2   : > { %v1463_v40 = vpop.eup %1462 }
 0x2d3   : > { %v1121_v41 = vadd.f32 1.0, %v1463_v40 }
 0x2d4   : > { %v1465_v42 = vpop.eup %1464 }
 0x2d5   : > { %1468 = vrcp.f32 %v1121_v41  ;;  %v1122_v44 = vadd.f32 1.0, %v1465_v42  ;;  %v1467_v45 = vpop.eup %1466 }
 0x2d6   : > { %1470 = vtanh.f32 %v1108_v35  ;;  %v1123_v50 = vadd.f32 1.0, %v1467_v45 }
 0x2d7   : > { %1472 = vrcp.f32 %v1122_v44 }
 0x2d8   : > { %1474 = vrcp.f32 %v1123_v50 }
 0x2e2   : > { %v1469_v46 = vpop.eup %1468 }
 0x2e3   : > { %v1471_v49 = vpop.eup %1470 }
 0x2e4   : > { %v1473_v43 = vpop.eup %1472  ;;  %v1132_v51 = vmul.f32 %v1471_v49, %v1469_v46 }
 0x2e5   : > { %v1131_v52 = vmul.f32 %v1473_v43, %v819_v47  ;;  %v1475_v48 = vpop.eup %1474 }
 0x2e7   : > { %v1133_v32 = vadd.f32 %v1132_v51, %v1131_v52 }
 0x2e9   : > { %1139 = vst [vmem:[#allocation3] sm:$0xff] %v1133_v32  ;;  %1476 = vtanh.f32 %v1133_v32 }
 0x2f6   : > { %v1477_v53 = vpop.eup %1476 }
 0x2f7   : > { %v1135_v54 = vmul.f32 %v1477_v53, %v1475_v48 }
 0x2f9   : > { %1138 = vst [vmem:[#allocation2 + $0x8] sm:$0xff] %v1135_v54  ;;  %1433 = vmatmul.mubr.f32.vlgmr.msra.gmra.mxu1 %v1135_v54 }
 0x3b9   : > { %v1229_v57 = vpop.f32.mrf.mxu1 }
 0x3ba   : > { %v1230_v58 = vadd.f32 %v1327_v56, %v1229_v57 }
 0x3bb   : > { %v1434_v59 = vpop.f32.mrf.mxu1 }
 0x3bc   : > { %1233 = vst [vmem:[%s1586_s16] sm:$0xff] %v1230_v58  ;;  %v1238_v60 = vsel %vm1237_vm1, %v1230_v58, -1e+30 }
 0x3bd   : > { %1239 = vmax.xlane.f32.xlu0 %v1238_v60 }
 0x446   : > { %v1240_v62 = vpop.xlane.xlu0 %1239 }
 0x447   : > { %vm1241_vm2 = vcmp.eq.f32.partialorder %v1238_v60, %v1240_v62 }
 0x448   : > { %v1242_v63 = vsel %vm1241_vm2, %v1236_v61, 128.0 }
 0x449   : > { %1243 = vmin.xlane.f32.xlu0 %v1242_v63 }
 0x4d2   : > { %v1244_v2 = vpop.xlane.xlu0 %1243 }
 0x4d3   : > { %vm1245_vm3 = vcmp.eq.f32.partialorder %v1236_v61, %v1244_v2 }
 0x4d4   : > { %v1328_v4 = vsel %vm1245_vm3, 1.0, %v1501_v6 }
 0x4d5   : > { %v1257_v5 = vmul.f32 %v1328_v4, %v1256_v1 }
 0x4d7   : > { %v1258_v7 = vadd.f32 %v1257_v5, %v1254_v3 }
 0x4d9   : > { %1259 = vst [vmem:[#allocation4] sm:$0xff] %v1258_v7 }
 0x4da PF: > { %s28_s26 = sadd.s32 1, %s1498_s26  }
 0x4db   : > { %p25_p12 = scmp.ge.s32.totalorder %s28_s26, 9  }
 0x4dd   :  { %27 = sbr.rel (!%p25_p12) target bundleno = 16 (0x10), region = 100 }

</bundles_post_ra>
